<compile_context>
chip_gen: v7x
topology: tpu7x:2x2x1
jax: 0.10.0
libtpu: 0.0.40
codegen_flags: <defaults>
</compile_context>

<pallas_src>
import jax
import jax.numpy as jnp
from jax.experimental import pallas as pl
from jax.experimental.pallas import tpu as pltpu


def _round_up(x: int, m: int) -> int:
    return ((x + m - 1) // m) * m


def _relation_head_kernel(
    src_ref,      # (Bt, S_p, Hs_p)   compute dtype
    tgt_ref,      # (Bt, T_p, Ht_p)   compute dtype
    ws_ref,       # (Hs_p, D_p)       compute dtype
    bs_ref,       # (1, D_p)          float32
    wt_ref,       # (Ht_p, D_p)       compute dtype
    bt_ref,       # (1, D_p)          float32
    as_ref,       # (Hs_p, LR_p)      compute dtype   (fused LoRA-A, source)
    at_ref,       # (Ht_p, LR_p)      compute dtype   (fused LoRA-A, target)
    lbs_ref,      # (L, R, D_p)       compute dtype   (LoRA-B, source)
    lbt_ref,      # (L, R, D_p)       compute dtype   (LoRA-B, target)
    out_ref,      # (Bt, L*S_p, T_p)  float32         (lane-dense logits slab)
    hs_scr,       # (Bt*S_p, D_p)     float32 scratch
    ht_scr,       # (Bt*T_p, D_p)     float32 scratch
    slo_scr,      # (Bt*S_p, LR_p)    float32 scratch
    tlo_scr,      # (Bt*T_p, LR_p)    float32 scratch
):
    Bt, S, _ = src_ref.shape
    _, T, _ = tgt_ref.shape
    L, R, D = lbs_ref.shape
    cd = src_ref.dtype

    # Flatten (Bt, S, H) -> (Bt*S, H): merges leading dims only (layout-free),
    # fills MXU rows with the whole batch block at once.
    src = src_ref[...].reshape(Bt * S, src_ref.shape[2])
    tgt = tgt_ref[...].reshape(Bt * T, tgt_ref.shape[2])

    # Base projections + bias — computed ONCE per batch block, f32 accumulate.
    hs_scr[...] = (
        jnp.dot(src, ws_ref[...], preferred_element_type=jnp.float32) + bs_ref[...]
    )
    ht_scr[...] = (
        jnp.dot(tgt, wt_ref[...], preferred_element_type=jnp.float32) + bt_ref[...]
    )

    # Fused LoRA-A: one wide (M, H) @ (H, L*R_p) matmul instead of L skinny ones.
    slo_scr[...] = jnp.dot(src, as_ref[...], preferred_element_type=jnp.float32)
    tlo_scr[...] = jnp.dot(tgt, at_ref[...], preferred_element_type=jnp.float32)

    # K = R is a pathological MXU contraction for small R -> use VPU rank-1
    # accumulates instead; keep the MXU path only for reasonably large R.
    use_vpu_lora_b = R < 32

    # Static unroll over relations; intermediates live in VMEM scratch so the
    # unroll does not blow vreg live ranges.  TODO(synk): grid axis / fori_loop
    # for large L.
    for l in range(L):
        src_out = hs_scr[...]                                    # (Bt*S, D) f32
        tgt_out = ht_scr[...]                                    # (Bt*T, D) f32
        if use_vpu_lora_b:
            for r in range(R):
                c = l * R + r
                src_out = src_out + slo_scr[:, c:c + 1] * lbs_ref[l, r:r + 1, :]
                tgt_out = tgt_out + tlo_scr[:, c:c + 1] * lbt_ref[l, r:r + 1, :]
        else:
            s_lo = slo_scr[:, pl.ds(l * R, R)].astype(cd)
            t_lo = tlo_scr[:, pl.ds(l * R, R)].astype(cd)
            src_out = src_out + jnp.dot(
                s_lo, lbs_ref[l], preferred_element_type=jnp.float32)
            tgt_out = tgt_out + jnp.dot(
                t_lo, lbt_ref[l], preferred_element_type=jnp.float32)

        # Batched, transpose-free contraction over the hidden dim.
        logits = jnp.einsum(
            "bsd,btd->bst",
            src_out.reshape(Bt, S, D).astype(cd),
            tgt_out.reshape(Bt, T, D).astype(cd),
            preferred_element_type=jnp.float32,
        )                                                        # (Bt, S, T_p)
        # Lane-dense store: last dim is T_p (multiple of 128), offset is a
        # static multiple of S (>= 8 sublanes) -> unmasked full-width vst.
        out_ref[:, pl.ds(l * S, S), :] = logits.astype(out_ref.dtype)


def lora_relation_heads(src, tgt, params, *, compute_dtype=jnp.bfloat16):
    """src: (B, S, Hs), tgt: (B, T, Ht) -> logits (B, L, S, T) float32."""
    ws, bs, wt, bt, la_s, lb_s, la_t, lb_t = params
    B, S, Hs = src.shape
    _, T, Ht = tgt.shape
    D = ws.shape[1]
    L, _, R = la_s.shape
    cd = compute_dtype

    # ---- Padded sizes (zero padding is numerically free, outputs sliced). ----
    Hs_p = _round_up(Hs, 128)
    Ht_p = _round_up(Ht, 128)
    D_p = _round_up(D, 128)
    S_p = _round_up(S, 8)
    T_p = _round_up(T, 128)          # lane-dense output last dim
    LR = L * R
    LR_p = _round_up(LR, 128)

    # ---- Batch blocking: target ~256 MXU rows per step (v6e/v7x), but keep
    # >= 2 grid steps when B >= 2 so both v7x TensorCores get work. ----
    Bt = max(1, min(B, max(1, 256 // S_p)))
    if B >= 2:
        Bt = min(Bt, max(1, (B + 1) // 2))
    B_p = _round_up(B, Bt)
    num_blocks = B_p // Bt

    def pad_to(x, shape):
        return jnp.pad(x, [(0, n - s) for s, n in zip(x.shape, shape)])

    # MXU operands in compute dtype; biases stay f32 (added onto f32 accum).
    src_p = pad_to(src, (B_p, S_p, Hs_p)).astype(cd)
    tgt_p = pad_to(tgt, (B_p, T_p, Ht_p)).astype(cd)
    ws_p = pad_to(ws, (Hs_p, D_p)).astype(cd)
    wt_p = pad_to(wt, (Ht_p, D_p)).astype(cd)
    bs_p = pad_to(bs, (1, D_p)).astype(jnp.float32)
    bt_p = pad_to(bt, (1, D_p)).astype(jnp.float32)
    # Fused LoRA-A: (L, H, R) -> (H, L*R), column c = l*R + r, zero-padded.
    a_s = pad_to(jnp.transpose(la_s, (1, 0, 2)).reshape(Hs, LR), (Hs_p, LR_p)).astype(cd)
    a_t = pad_to(jnp.transpose(la_t, (1, 0, 2)).reshape(Ht, LR), (Ht_p, LR_p)).astype(cd)
    lb_s_p = pad_to(lb_s, (L, R, D_p)).astype(cd)
    lb_t_p = pad_to(lb_t, (L, R, D_p)).astype(cd)

    # Advisory cost estimate (unpadded nominal FLOPs / bytes).
    flops = 2 * B * (
        S * Hs * D + T * Ht * D
        + L * (S * Hs * R + S * R * D + T * Ht * R + T * R * D + S * D * T)
    )
    bytes_accessed = 4 * (
        src.size + tgt.size + ws.size + wt.size + bs.size + bt.size
        + la_s.size + lb_s.size + la_t.size + lb_t.size + B * L * S * T
    )
    cost = pl.CostEstimate(
        flops=int(flops), transcendentals=0, bytes_accessed=int(bytes_accessed))

    out = pl.pallas_call(
        _relation_head_kernel,
        out_shape=jax.ShapeDtypeStruct((B_p, L * S_p, T_p), jnp.float32),
        grid_spec=pltpu.PrefetchScalarGridSpec(
            num_scalar_prefetch=0,
            grid=(num_blocks,),
            in_specs=[
                pl.BlockSpec((Bt, S_p, Hs_p), lambda b: (b, 0, 0)),   # src
                pl.BlockSpec((Bt, T_p, Ht_p), lambda b: (b, 0, 0)),   # tgt
                pl.BlockSpec((Hs_p, D_p), lambda b: (0, 0)),          # W_source
                pl.BlockSpec((1, D_p), lambda b: (0, 0)),             # b_source
                pl.BlockSpec((Ht_p, D_p), lambda b: (0, 0)),          # W_target
                pl.BlockSpec((1, D_p), lambda b: (0, 0)),             # b_target
                pl.BlockSpec((Hs_p, LR_p), lambda b: (0, 0)),         # LoRA-A src (fused)
                pl.BlockSpec((Ht_p, LR_p), lambda b: (0, 0)),         # LoRA-A tgt (fused)
                pl.BlockSpec((L, R, D_p), lambda b: (0, 0, 0)),       # LoRA-B src
                pl.BlockSpec((L, R, D_p), lambda b: (0, 0, 0)),       # LoRA-B tgt
            ],
            out_specs=pl.BlockSpec((Bt, L * S_p, T_p), lambda b: (b, 0, 0)),
            scratch_shapes=[
                pltpu.VMEM((Bt * S_p, D_p), jnp.float32),   # h_src
                pltpu.VMEM((Bt * T_p, D_p), jnp.float32),   # h_tgt
                pltpu.VMEM((Bt * S_p, LR_p), jnp.float32),  # src @ A_all
                pltpu.VMEM((Bt * T_p, LR_p), jnp.float32),  # tgt @ A_all
            ],
        ),
        compiler_params=pltpu.CompilerParams(
            dimension_semantics=("parallel",),
            vmem_limit_bytes=64 * 1024 * 1024,
        ),
        cost_estimate=cost,
    )(src_p, tgt_p, ws_p, bs_p, wt_p, bt_p, a_s, a_t, lb_s_p, lb_t_p)

    # Lane-dense slab -> (B, L, S, T): reshape + slice away zero padding.
    out = out.reshape(B_p, L, S_p, T_p)[:B, :, :S, :T]
    return out


def reference(src, tgt, params):
    """Pure-JAX (float32) transcription of the PyTorch forward."""
    ws, bs, wt, bt, la_s, lb_s, la_t, lb_t = params
    h_src = src @ ws + bs[0]                                   # (B,S,D)
    h_tgt = tgt @ wt + bt[0]                                   # (B,T,D)
    delta_s = jnp.einsum("lhr,lrd->lhd", la_s, lb_s)           # (L,Hs,D)
    delta_t = jnp.einsum("lhr,lrd->lhd", la_t, lb_t)           # (L,Ht,D)
    dso = jnp.einsum("bsh,lhd->bsld", src, delta_s)            # (B,S,L,D)
    dto = jnp.einsum("bth,lhd->btld", tgt, delta_t)            # (B,T,L,D)
    src_out = h_src[:, :, None, :] + dso                       # (B,S,L,D)
    tgt_out = h_tgt[:, :, None, :] + dto                       # (B,T,L,D)
    # permute(0,2,1,3) then matmul over hidden -> (B,L,S,T)
    return jnp.einsum("bild,bjld->blij", src_out, tgt_out)


def make_params(key, num_relations, source_hidden, target_hidden, rank):
    D = source_hidden  # output_size = source_hidden_size
    ks = jax.random.split(key, 8)
    scale_s = 1.0 / jnp.sqrt(source_hidden)
    scale_t = 1.0 / jnp.sqrt(target_hidden)
    ws = jax.random.uniform(ks[0], (source_hidden, D), jnp.float32, -scale_s, scale_s)
    bs = jax.random.uniform(ks[1], (1, D), jnp.float32, -scale_s, scale_s)
    wt = jax.random.uniform(ks[2], (target_hidden, D), jnp.float32, -scale_t, scale_t)
    bt = jax.random.uniform(ks[3], (1, D), jnp.float32, -scale_t, scale_t)
    # LoRA factors (dense_b is zero-init in the original module; small random
    # values here so the delta path is actually exercised).
    la_s = jax.random.normal(ks[4], (num_relations, source_hidden, rank), jnp.float32) * 0.1
    lb_s = jax.random.normal(ks[5], (num_relations, rank, D), jnp.float32) * 0.1
    la_t = jax.random.normal(ks[6], (num_relations, target_hidden, rank), jnp.float32) * 0.1
    lb_t = jax.random.normal(ks[7], (num_relations, rank, D), jnp.float32) * 0.1
    return ws, bs, wt, bt, la_s, lb_s, la_t, lb_t


if __name__ == "__main__":
    B, S, T = 2, 8, 8
    source_hidden = 32
    target_hidden = 32
    num_relations = 4
    rank = 2

    key = jax.random.PRNGKey(0)
    k_src, k_tgt, k_par = jax.random.split(key, 3)
    src = jax.random.normal(k_src, (B, S, source_hidden), jnp.float32)
    tgt = jax.random.normal(k_tgt, (B, T, target_hidden), jnp.float32)
    params = make_params(k_par, num_relations, source_hidden, target_hidden, rank)

    ref = reference(src, tgt, params)

    # 1) Full-f32 compute path: exact module semantics, tight tolerance.
    out_f32 = lora_relation_heads(src, tgt, params, compute_dtype=jnp.float32)
    out_f32 = jax.block_until_ready(out_f32)
    assert out_f32.shape == (B, num_relations, S, T), out_f32.shape
    assert jnp.allclose(out_f32, ref, atol=1e-4, rtol=1e-4), float(
        jnp.max(jnp.abs(out_f32 - ref)))

    # 2) bf16-operand / f32-accumulate path (default; matches v6e/v7x MXU),
    #    validated against the f32 reference with a looser tolerance.
    out_bf16 = lora_relation_heads(src, tgt, params)
    out_bf16 = jax.block_until_ready(out_bf16)
    assert out_bf16.shape == (B, num_relations, S, T), out_bf16.shape
    assert jnp.allclose(out_bf16, ref, atol=0.25, rtol=0.05), float(
        jnp.max(jnp.abs(out_bf16 - ref)))

    print("KERNEL_OK")
</pallas_src>

<mosaic_0001>
module attributes {stable_mosaic.version = 11 : i64} {
  func.func @_relation_head_kernel(%arg0: i32, %arg1: memref<1x8x128xf32, #tpu.memory_space<vmem>>, %arg2: memref<1x128x128xf32, #tpu.memory_space<vmem>>, %arg3: memref<128x128xf32, #tpu.memory_space<vmem>>, %arg4: memref<1x128xf32, #tpu.memory_space<vmem>>, %arg5: memref<128x128xf32, #tpu.memory_space<vmem>>, %arg6: memref<1x128xf32, #tpu.memory_space<vmem>>, %arg7: memref<128x128xf32, #tpu.memory_space<vmem>>, %arg8: memref<128x128xf32, #tpu.memory_space<vmem>>, %arg9: memref<4x2x128xf32, #tpu.memory_space<vmem>>, %arg10: memref<4x2x128xf32, #tpu.memory_space<vmem>>, %arg11: memref<1x32x128xf32, #tpu.memory_space<vmem>>, %arg12: memref<8x128xf32, #tpu.memory_space<vmem>>, %arg13: memref<128x128xf32, #tpu.memory_space<vmem>>, %arg14: memref<8x128xf32, #tpu.memory_space<vmem>>, %arg15: memref<128x128xf32, #tpu.memory_space<vmem>>) attributes {dimension_semantics = [#tpu.dimension_semantics<parallel>], iteration_bounds = array<i64: 2>, scalar_prefetch = 0 : i64, scratch_operands = 4 : i64, tpu.core_type = #tpu.core_type<tc>, window_params = [{transform_indices = @transform_0, window_bounds = array<i64: 1, 8, 128>}, {transform_indices = @transform_1, window_bounds = array<i64: 1, 128, 128>}, {pipeline_mode = #tpu.pipeline_mode<synchronous>, transform_indices = @transform_2, window_bounds = array<i64: 128, 128>}, {pipeline_mode = #tpu.pipeline_mode<synchronous>, transform_indices = @transform_3, window_bounds = array<i64: 1, 128>}, {pipeline_mode = #tpu.pipeline_mode<synchronous>, transform_indices = @transform_4, window_bounds = array<i64: 128, 128>}, {pipeline_mode = #tpu.pipeline_mode<synchronous>, transform_indices = @transform_5, window_bounds = array<i64: 1, 128>}, {pipeline_mode = #tpu.pipeline_mode<synchronous>, transform_indices = @transform_6, window_bounds = array<i64: 128, 128>}, {pipeline_mode = #tpu.pipeline_mode<synchronous>, transform_indices = @transform_7, window_bounds = array<i64: 128, 128>}, {pipeline_mode = #tpu.pipeline_mode<synchronous>, transform_indices = @transform_8, window_bounds = array<i64: 4, 2, 128>}, {pipeline_mode = #tpu.pipeline_mode<synchronous>, transform_indices = @transform_9, window_bounds = array<i64: 4, 2, 128>}, {transform_indices = @transform_10, window_bounds = array<i64: 1, 32, 128>}]} {
    %c0 = arith.constant 0 : index
    %c0_0 = arith.constant 0 : index
    %c0_1 = arith.constant 0 : index
    %0 = vector.load %arg1[%c0, %c0_0, %c0_1] : memref<1x8x128xf32, #tpu.memory_space<vmem>>, vector<1x8x128xf32>
    %1 = vector.shape_cast %0 : vector<1x8x128xf32> to vector<8x128xf32>
    %c0_2 = arith.constant 0 : index
    %c0_3 = arith.constant 0 : index
    %c0_4 = arith.constant 0 : index
    %2 = vector.load %arg2[%c0_2, %c0_3, %c0_4] : memref<1x128x128xf32, #tpu.memory_space<vmem>>, vector<1x128x128xf32>
    %3 = vector.shape_cast %2 : vector<1x128x128xf32> to vector<128x128xf32>
    %c0_5 = arith.constant 0 : index
    %c0_6 = arith.constant 0 : index
    %4 = vector.load %arg3[%c0_5, %c0_6] : memref<128x128xf32, #tpu.memory_space<vmem>>, vector<128x128xf32>
    %cst = arith.constant dense<0.000000e+00> : vector<8x128xf32>
    %5 = tpu.matmul %1, %4, %cst {dimension_numbers = #tpu.dot_dimension_numbers<[1], [0], [0], [1], [0, 0, 1, 1], [], []>} : vector<8x128xf32>, vector<128x128xf32>, vector<8x128xf32> -> vector<8x128xf32>
    %c0_7 = arith.constant 0 : index
    %c0_8 = arith.constant 0 : index
    %6 = vector.load %arg4[%c0_7, %c0_8] : memref<1x128xf32, #tpu.memory_space<vmem>>, vector<1x128xf32>
    %7 = vector.broadcast %6 : vector<1x128xf32> to vector<8x128xf32>
    %8 = arith.addf %5, %7 : vector<8x128xf32>
    %c0_9 = arith.constant 0 : index
    %c0_10 = arith.constant 0 : index
    %9 = vector.load %arg12[%c0_9, %c0_10] : memref<8x128xf32, #tpu.memory_space<vmem>>, vector<8x128xf32>
    tpu.vector_store %arg12[%c0_9, %c0_10], %8 {strides = array<i32>} : memref<8x128xf32, #tpu.memory_space<vmem>>, vector<8x128xf32>,
    %c0_11 = arith.constant 0 : index
    %c0_12 = arith.constant 0 : index
    %10 = vector.load %arg5[%c0_11, %c0_12] : memref<128x128xf32, #tpu.memory_space<vmem>>, vector<128x128xf32>
    %cst_13 = arith.constant dense<0.000000e+00> : vector<128x128xf32>
    %11 = tpu.matmul %3, %10, %cst_13 {dimension_numbers = #tpu.dot_dimension_numbers<[1], [0], [0], [1], [0, 0, 1, 1], [], []>} : vector<128x128xf32>, vector<128x128xf32>, vector<128x128xf32> -> vector<128x128xf32>
    %c0_14 = arith.constant 0 : index
    %c0_15 = arith.constant 0 : index
    %12 = vector.load %arg6[%c0_14, %c0_15] : memref<1x128xf32, #tpu.memory_space<vmem>>, vector<1x128xf32>
    %13 = vector.broadcast %12 : vector<1x128xf32> to vector<128x128xf32>
    %14 = arith.addf %11, %13 : vector<128x128xf32>
    %c0_16 = arith.constant 0 : index
    %c0_17 = arith.constant 0 : index
    %15 = vector.load %arg13[%c0_16, %c0_17] : memref<128x128xf32, #tpu.memory_space<vmem>>, vector<128x128xf32>
    tpu.vector_store %arg13[%c0_16, %c0_17], %14 {strides = array<i32>} : memref<128x128xf32, #tpu.memory_space<vmem>>, vector<128x128xf32>,
    %c0_18 = arith.constant 0 : index
    %c0_19 = arith.constant 0 : index
    %16 = vector.load %arg7[%c0_18, %c0_19] : memref<128x128xf32, #tpu.memory_space<vmem>>, vector<128x128xf32>
    %cst_20 = arith.constant dense<0.000000e+00> : vector<8x128xf32>
    %17 = tpu.matmul %1, %16, %cst_20 {dimension_numbers = #tpu.dot_dimension_numbers<[1], [0], [0], [1], [0, 0, 1, 1], [], []>} : vector<8x128xf32>, vector<128x128xf32>, vector<8x128xf32> -> vector<8x128xf32>
    %c0_21 = arith.constant 0 : index
    %c0_22 = arith.constant 0 : index
    %18 = vector.load %arg14[%c0_21, %c0_22] : memref<8x128xf32, #tpu.memory_space<vmem>>, vector<8x128xf32>
    tpu.vector_store %arg14[%c0_21, %c0_22], %17 {strides = array<i32>} : memref<8x128xf32, #tpu.memory_space<vmem>>, vector<8x128xf32>,
    %c0_23 = arith.constant 0 : index
    %c0_24 = arith.constant 0 : index
    %19 = vector.load %arg8[%c0_23, %c0_24] : memref<128x128xf32, #tpu.memory_space<vmem>>, vector<128x128xf32>
    %cst_25 = arith.constant dense<0.000000e+00> : vector<128x128xf32>
    %20 = tpu.matmul %3, %19, %cst_25 {dimension_numbers = #tpu.dot_dimension_numbers<[1], [0], [0], [1], [0, 0, 1, 1], [], []>} : vector<128x128xf32>, vector<128x128xf32>, vector<128x128xf32> -> vector<128x128xf32>
    %c0_26 = arith.constant 0 : index
    %c0_27 = arith.constant 0 : index
    %21 = vector.load %arg15[%c0_26, %c0_27] : memref<128x128xf32, #tpu.memory_space<vmem>>, vector<128x128xf32>
    tpu.vector_store %arg15[%c0_26, %c0_27], %20 {strides = array<i32>} : memref<128x128xf32, #tpu.memory_space<vmem>>, vector<128x128xf32>,
    %c0_28 = arith.constant 0 : index
    %c0_29 = arith.constant 0 : index
    %22 = vector.load %arg12[%c0_28, %c0_29] : memref<8x128xf32, #tpu.memory_space<vmem>>, vector<8x128xf32>
    %c0_30 = arith.constant 0 : index
    %c0_31 = arith.constant 0 : index
    %23 = vector.load %arg13[%c0_30, %c0_31] : memref<128x128xf32, #tpu.memory_space<vmem>>, vector<128x128xf32>
    %c0_32 = arith.constant 0 : index
    %c0_33 = arith.constant 0 : index
    %24 = vector.load %arg14[%c0_32, %c0_33] : memref<8x128xf32, #tpu.memory_space<vmem>>, vector<8x1xf32>
    %c0_34 = arith.constant 0 : index
    %c0_35 = arith.constant 0 : index
    %c0_36 = arith.constant 0 : index
    %25 = vector.load %arg9[%c0_34, %c0_35, %c0_36] : memref<4x2x128xf32, #tpu.memory_space<vmem>>, vector<1x1x128xf32>
    %26 = vector.shape_cast %25 : vector<1x1x128xf32> to vector<1x128xf32>
    %27 = vector.broadcast %24 : vector<8x1xf32> to vector<8x128xf32>
    %28 = vector.broadcast %26 : vector<1x128xf32> to vector<8x128xf32>
    %29 = arith.mulf %27, %28 : vector<8x128xf32>
    %30 = arith.addf %22, %29 : vector<8x128xf32>
    %c0_37 = arith.constant 0 : index
    %c0_38 = arith.constant 0 : index
    %31 = vector.load %arg15[%c0_37, %c0_38] : memref<128x128xf32, #tpu.memory_space<vmem>>, vector<128x1xf32>
    %c0_39 = arith.constant 0 : index
    %c0_40 = arith.constant 0 : index
    %c0_41 = arith.constant 0 : index
    %32 = vector.load %arg10[%c0_39, %c0_40, %c0_41] : memref<4x2x128xf32, #tpu.memory_space<vmem>>, vector<1x1x128xf32>
    %33 = vector.shape_cast %32 : vector<1x1x128xf32> to vector<1x128xf32>
    %34 = vector.broadcast %31 : vector<128x1xf32> to vector<128x128xf32>
    %35 = vector.broadcast %33 : vector<1x128xf32> to vector<128x128xf32>
    %36 = arith.mulf %34, %35 : vector<128x128xf32>
    %37 = arith.addf %23, %36 : vector<128x128xf32>
    %c0_42 = arith.constant 0 : index
    %c1 = arith.constant 1 : index
    %38 = vector.load %arg14[%c0_42, %c1] : memref<8x128xf32, #tpu.memory_space<vmem>>, vector<8x1xf32>
    %c0_43 = arith.constant 0 : index
    %c1_44 = arith.constant 1 : index
    %c0_45 = arith.constant 0 : index
    %39 = vector.load %arg9[%c0_43, %c1_44, %c0_45] : memref<4x2x128xf32, #tpu.memory_space<vmem>>, vector<1x1x128xf32>
    %40 = vector.shape_cast %39 : vector<1x1x128xf32> to vector<1x128xf32>
    %41 = vector.broadcast %38 : vector<8x1xf32> to vector<8x128xf32>
    %42 = vector.broadcast %40 : vector<1x128xf32> to vector<8x128xf32>
    %43 = arith.mulf %41, %42 : vector<8x128xf32>
    %44 = arith.addf %30, %43 : vector<8x128xf32>
    %c0_46 = arith.constant 0 : index
    %c1_47 = arith.constant 1 : index
    %45 = vector.load %arg15[%c0_46, %c1_47] : memref<128x128xf32, #tpu.memory_space<vmem>>, vector<128x1xf32>
    %c0_48 = arith.constant 0 : index
    %c1_49 = arith.constant 1 : index
    %c0_50 = arith.constant 0 : index
    %46 = vector.load %arg10[%c0_48, %c1_49, %c0_50] : memref<4x2x128xf32, #tpu.memory_space<vmem>>, vector<1x1x128xf32>
    %47 = vector.shape_cast %46 : vector<1x1x128xf32> to vector<1x128xf32>
    %48 = vector.broadcast %45 : vector<128x1xf32> to vector<128x128xf32>
    %49 = vector.broadcast %47 : vector<1x128xf32> to vector<128x128xf32>
    %50 = arith.mulf %48, %49 : vector<128x128xf32>
    %51 = arith.addf %37, %50 : vector<128x128xf32>
    %52 = vector.shape_cast %44 : vector<8x128xf32> to vector<1x8x128xf32>
    %53 = vector.shape_cast %51 : vector<128x128xf32> to vector<1x128x128xf32>
    "tpu.trace_start"() <{level = 10 : i32, message = "bsd,btd->bst"}> : () -> ()
    %cst_51 = arith.constant dense<0.000000e+00> : vector<1x8x128xf32>
    %54 = tpu.matmul %52, %53, %cst_51 {dimension_numbers = #tpu.dot_dimension_numbers<[2], [2], [1], [1], [0, 0, 0, 1, 1, 1], [0], [0]>} : vector<1x8x128xf32>, vector<1x128x128xf32>, vector<1x8x128xf32> -> vector<1x8x128xf32>
    "tpu.trace_stop"() : () -> ()
    %c0_52 = arith.constant 0 : index
    %c0_53 = arith.constant 0 : index
    %c0_54 = arith.constant 0 : index
    %55 = vector.load %arg11[%c0_52, %c0_53, %c0_54] : memref<1x32x128xf32, #tpu.memory_space<vmem>>, vector<1x8x128xf32>
    tpu.vector_store %arg11[%c0_52, %c0_53, %c0_54], %54 {strides = array<i32>} : memref<1x32x128xf32, #tpu.memory_space<vmem>>, vector<1x8x128xf32>,
    %c0_55 = arith.constant 0 : index
    %c0_56 = arith.constant 0 : index
    %56 = vector.load %arg12[%c0_55, %c0_56] : memref<8x128xf32, #tpu.memory_space<vmem>>, vector<8x128xf32>
    %c0_57 = arith.constant 0 : index
    %c0_58 = arith.constant 0 : index
    %57 = vector.load %arg13[%c0_57, %c0_58] : memref<128x128xf32, #tpu.memory_space<vmem>>, vector<128x128xf32>
    %c0_59 = arith.constant 0 : index
    %c2 = arith.constant 2 : index
    %58 = vector.load %arg14[%c0_59, %c2] : memref<8x128xf32, #tpu.memory_space<vmem>>, vector<8x1xf32>
    %c1_60 = arith.constant 1 : index
    %c0_61 = arith.constant 0 : index
    %c0_62 = arith.constant 0 : index
    %59 = vector.load %arg9[%c1_60, %c0_61, %c0_62] : memref<4x2x128xf32, #tpu.memory_space<vmem>>, vector<1x1x128xf32>
    %60 = vector.shape_cast %59 : vector<1x1x128xf32> to vector<1x128xf32>
    %61 = vector.broadcast %58 : vector<8x1xf32> to vector<8x128xf32>
    %62 = vector.broadcast %60 : vector<1x128xf32> to vector<8x128xf32>
    %63 = arith.mulf %61, %62 : vector<8x128xf32>
    %64 = arith.addf %56, %63 : vector<8x128xf32>
    %c0_63 = arith.constant 0 : index
    %c2_64 = arith.constant 2 : index
    %65 = vector.load %arg15[%c0_63, %c2_64] : memref<128x128xf32, #tpu.memory_space<vmem>>, vector<128x1xf32>
    %c1_65 = arith.constant 1 : index
    %c0_66 = arith.constant 0 : index
    %c0_67 = arith.constant 0 : index
    %66 = vector.load %arg10[%c1_65, %c0_66, %c0_67] : memref<4x2x128xf32, #tpu.memory_space<vmem>>, vector<1x1x128xf32>
    %67 = vector.shape_cast %66 : vector<1x1x128xf32> to vector<1x128xf32>
    %68 = vector.broadcast %65 : vector<128x1xf32> to vector<128x128xf32>
    %69 = vector.broadcast %67 : vector<1x128xf32> to vector<128x128xf32>
    %70 = arith.mulf %68, %69 : vector<128x128xf32>
    %71 = arith.addf %57, %70 : vector<128x128xf32>
    %c0_68 = arith.constant 0 : index
    %c3 = arith.constant 3 : index
    %72 = vector.load %arg14[%c0_68, %c3] : memref<8x128xf32, #tpu.memory_space<vmem>>, vector<8x1xf32>
    %c1_69 = arith.constant 1 : index
    %c1_70 = arith.constant 1 : index
    %c0_71 = arith.constant 0 : index
    %73 = vector.load %arg9[%c1_69, %c1_70, %c0_71] : memref<4x2x128xf32, #tpu.memory_space<vmem>>, vector<1x1x128xf32>
    %74 = vector.shape_cast %73 : vector<1x1x128xf32> to vector<1x128xf32>
    %75 = vector.broadcast %72 : vector<8x1xf32> to vector<8x128xf32>
    %76 = vector.broadcast %74 : vector<1x128xf32> to vector<8x128xf32>
    %77 = arith.mulf %75, %76 : vector<8x128xf32>
    %78 = arith.addf %64, %77 : vector<8x128xf32>
    %c0_72 = arith.constant 0 : index
    %c3_73 = arith.constant 3 : index
    %79 = vector.load %arg15[%c0_72, %c3_73] : memref<128x128xf32, #tpu.memory_space<vmem>>, vector<128x1xf32>
    %c1_74 = arith.constant 1 : index
    %c1_75 = arith.constant 1 : index
    %c0_76 = arith.constant 0 : index
    %80 = vector.load %arg10[%c1_74, %c1_75, %c0_76] : memref<4x2x128xf32, #tpu.memory_space<vmem>>, vector<1x1x128xf32>
    %81 = vector.shape_cast %80 : vector<1x1x128xf32> to vector<1x128xf32>
    %82 = vector.broadcast %79 : vector<128x1xf32> to vector<128x128xf32>
    %83 = vector.broadcast %81 : vector<1x128xf32> to vector<128x128xf32>
    %84 = arith.mulf %82, %83 : vector<128x128xf32>
    %85 = arith.addf %71, %84 : vector<128x128xf32>
    %86 = vector.shape_cast %78 : vector<8x128xf32> to vector<1x8x128xf32>
    %87 = vector.shape_cast %85 : vector<128x128xf32> to vector<1x128x128xf32>
    "tpu.trace_start"() <{level = 10 : i32, message = "bsd,btd->bst"}> : () -> ()
    %cst_77 = arith.constant dense<0.000000e+00> : vector<1x8x128xf32>
    %88 = tpu.matmul %86, %87, %cst_77 {dimension_numbers = #tpu.dot_dimension_numbers<[2], [2], [1], [1], [0, 0, 0, 1, 1, 1], [0], [0]>} : vector<1x8x128xf32>, vector<1x128x128xf32>, vector<1x8x128xf32> -> vector<1x8x128xf32>
    "tpu.trace_stop"() : () -> ()
    %c0_78 = arith.constant 0 : index
    %c8 = arith.constant 8 : index
    %c0_79 = arith.constant 0 : index
    %89 = vector.load %arg11[%c0_78, %c8, %c0_79] : memref<1x32x128xf32, #tpu.memory_space<vmem>>, vector<1x8x128xf32>
    tpu.vector_store %arg11[%c0_78, %c8, %c0_79], %88 {strides = array<i32>} : memref<1x32x128xf32, #tpu.memory_space<vmem>>, vector<1x8x128xf32>,
    %c0_80 = arith.constant 0 : index
    %c0_81 = arith.constant 0 : index
    %90 = vector.load %arg12[%c0_80, %c0_81] : memref<8x128xf32, #tpu.memory_space<vmem>>, vector<8x128xf32>
    %c0_82 = arith.constant 0 : index
    %c0_83 = arith.constant 0 : index
    %91 = vector.load %arg13[%c0_82, %c0_83] : memref<128x128xf32, #tpu.memory_space<vmem>>, vector<128x128xf32>
    %c0_84 = arith.constant 0 : index
    %c4 = arith.constant 4 : index
    %92 = vector.load %arg14[%c0_84, %c4] : memref<8x128xf32, #tpu.memory_space<vmem>>, vector<8x1xf32>
    %c2_85 = arith.constant 2 : index
    %c0_86 = arith.constant 0 : index
    %c0_87 = arith.constant 0 : index
    %93 = vector.load %arg9[%c2_85, %c0_86, %c0_87] : memref<4x2x128xf32, #tpu.memory_space<vmem>>, vector<1x1x128xf32>
    %94 = vector.shape_cast %93 : vector<1x1x128xf32> to vector<1x128xf32>
    %95 = vector.broadcast %92 : vector<8x1xf32> to vector<8x128xf32>
    %96 = vector.broadcast %94 : vector<1x128xf32> to vector<8x128xf32>
    %97 = arith.mulf %95, %96 : vector<8x128xf32>
    %98 = arith.addf %90, %97 : vector<8x128xf32>
    %c0_88 = arith.constant 0 : index
    %c4_89 = arith.constant 4 : index
    %99 = vector.load %arg15[%c0_88, %c4_89] : memref<128x128xf32, #tpu.memory_space<vmem>>, vector<128x1xf32>
    %c2_90 = arith.constant 2 : index
    %c0_91 = arith.constant 0 : index
    %c0_92 = arith.constant 0 : index
    %100 = vector.load %arg10[%c2_90, %c0_91, %c0_92] : memref<4x2x128xf32, #tpu.memory_space<vmem>>, vector<1x1x128xf32>
    %101 = vector.shape_cast %100 : vector<1x1x128xf32> to vector<1x128xf32>
    %102 = vector.broadcast %99 : vector<128x1xf32> to vector<128x128xf32>
    %103 = vector.broadcast %101 : vector<1x128xf32> to vector<128x128xf32>
    %104 = arith.mulf %102, %103 : vector<128x128xf32>
    %105 = arith.addf %91, %104 : vector<128x128xf32>
    %c0_93 = arith.constant 0 : index
    %c5 = arith.constant 5 : index
    %106 = vector.load %arg14[%c0_93, %c5] : memref<8x128xf32, #tpu.memory_space<vmem>>, vector<8x1xf32>
    %c2_94 = arith.constant 2 : index
    %c1_95 = arith.constant 1 : index
    %c0_96 = arith.constant 0 : index
    %107 = vector.load %arg9[%c2_94, %c1_95, %c0_96] : memref<4x2x128xf32, #tpu.memory_space<vmem>>, vector<1x1x128xf32>
    %108 = vector.shape_cast %107 : vector<1x1x128xf32> to vector<1x128xf32>
    %109 = vector.broadcast %106 : vector<8x1xf32> to vector<8x128xf32>
    %110 = vector.broadcast %108 : vector<1x128xf32> to vector<8x128xf32>
    %111 = arith.mulf %109, %110 : vector<8x128xf32>
    %112 = arith.addf %98, %111 : vector<8x128xf32>
    %c0_97 = arith.constant 0 : index
    %c5_98 = arith.constant 5 : index
    %113 = vector.load %arg15[%c0_97, %c5_98] : memref<128x128xf32, #tpu.memory_space<vmem>>, vector<128x1xf32>
    %c2_99 = arith.constant 2 : index
    %c1_100 = arith.constant 1 : index
    %c0_101 = arith.constant 0 : index
    %114 = vector.load %arg10[%c2_99, %c1_100, %c0_101] : memref<4x2x128xf32, #tpu.memory_space<vmem>>, vector<1x1x128xf32>
    %115 = vector.shape_cast %114 : vector<1x1x128xf32> to vector<1x128xf32>
    %116 = vector.broadcast %113 : vector<128x1xf32> to vector<128x128xf32>
    %117 = vector.broadcast %115 : vector<1x128xf32> to vector<128x128xf32>
    %118 = arith.mulf %116, %117 : vector<128x128xf32>
    %119 = arith.addf %105, %118 : vector<128x128xf32>
    %120 = vector.shape_cast %112 : vector<8x128xf32> to vector<1x8x128xf32>
    %121 = vector.shape_cast %119 : vector<128x128xf32> to vector<1x128x128xf32>
    "tpu.trace_start"() <{level = 10 : i32, message = "bsd,btd->bst"}> : () -> ()
    %cst_102 = arith.constant dense<0.000000e+00> : vector<1x8x128xf32>
    %122 = tpu.matmul %120, %121, %cst_102 {dimension_numbers = #tpu.dot_dimension_numbers<[2], [2], [1], [1], [0, 0, 0, 1, 1, 1], [0], [0]>} : vector<1x8x128xf32>, vector<1x128x128xf32>, vector<1x8x128xf32> -> vector<1x8x128xf32>
    "tpu.trace_stop"() : () -> ()
    %c0_103 = arith.constant 0 : index
    %c16 = arith.constant 16 : index
    %c0_104 = arith.constant 0 : index
    %123 = vector.load %arg11[%c0_103, %c16, %c0_104] : memref<1x32x128xf32, #tpu.memory_space<vmem>>, vector<1x8x128xf32>
    tpu.vector_store %arg11[%c0_103, %c16, %c0_104], %122 {strides = array<i32>} : memref<1x32x128xf32, #tpu.memory_space<vmem>>, vector<1x8x128xf32>,
    %c0_105 = arith.constant 0 : index
    %c0_106 = arith.constant 0 : index
    %124 = vector.load %arg12[%c0_105, %c0_106] : memref<8x128xf32, #tpu.memory_space<vmem>>, vector<8x128xf32>
    %c0_107 = arith.constant 0 : index
    %c0_108 = arith.constant 0 : index
    %125 = vector.load %arg13[%c0_107, %c0_108] : memref<128x128xf32, #tpu.memory_space<vmem>>, vector<128x128xf32>
    %c0_109 = arith.constant 0 : index
    %c6 = arith.constant 6 : index
    %126 = vector.load %arg14[%c0_109, %c6] : memref<8x128xf32, #tpu.memory_space<vmem>>, vector<8x1xf32>
    %c3_110 = arith.constant 3 : index
    %c0_111 = arith.constant 0 : index
    %c0_112 = arith.constant 0 : index
    %127 = vector.load %arg9[%c3_110, %c0_111, %c0_112] : memref<4x2x128xf32, #tpu.memory_space<vmem>>, vector<1x1x128xf32>
    %128 = vector.shape_cast %127 : vector<1x1x128xf32> to vector<1x128xf32>
    %129 = vector.broadcast %126 : vector<8x1xf32> to vector<8x128xf32>
    %130 = vector.broadcast %128 : vector<1x128xf32> to vector<8x128xf32>
    %131 = arith.mulf %129, %130 : vector<8x128xf32>
    %132 = arith.addf %124, %131 : vector<8x128xf32>
    %c0_113 = arith.constant 0 : index
    %c6_114 = arith.constant 6 : index
    %133 = vector.load %arg15[%c0_113, %c6_114] : memref<128x128xf32, #tpu.memory_space<vmem>>, vector<128x1xf32>
    %c3_115 = arith.constant 3 : index
    %c0_116 = arith.constant 0 : index
    %c0_117 = arith.constant 0 : index
    %134 = vector.load %arg10[%c3_115, %c0_116, %c0_117] : memref<4x2x128xf32, #tpu.memory_space<vmem>>, vector<1x1x128xf32>
    %135 = vector.shape_cast %134 : vector<1x1x128xf32> to vector<1x128xf32>
    %136 = vector.broadcast %133 : vector<128x1xf32> to vector<128x128xf32>
    %137 = vector.broadcast %135 : vector<1x128xf32> to vector<128x128xf32>
    %138 = arith.mulf %136, %137 : vector<128x128xf32>
    %139 = arith.addf %125, %138 : vector<128x128xf32>
    %c0_118 = arith.constant 0 : index
    %c7 = arith.constant 7 : index
    %140 = vector.load %arg14[%c0_118, %c7] : memref<8x128xf32, #tpu.memory_space<vmem>>, vector<8x1xf32>
    %c3_119 = arith.constant 3 : index
    %c1_120 = arith.constant 1 : index
    %c0_121 = arith.constant 0 : index
    %141 = vector.load %arg9[%c3_119, %c1_120, %c0_121] : memref<4x2x128xf32, #tpu.memory_space<vmem>>, vector<1x1x128xf32>
    %142 = vector.shape_cast %141 : vector<1x1x128xf32> to vector<1x128xf32>
    %143 = vector.broadcast %140 : vector<8x1xf32> to vector<8x128xf32>
    %144 = vector.broadcast %142 : vector<1x128xf32> to vector<8x128xf32>
    %145 = arith.mulf %143, %144 : vector<8x128xf32>
    %146 = arith.addf %132, %145 : vector<8x128xf32>
    %c0_122 = arith.constant 0 : index
    %c7_123 = arith.constant 7 : index
    %147 = vector.load %arg15[%c0_122, %c7_123] : memref<128x128xf32, #tpu.memory_space<vmem>>, vector<128x1xf32>
    %c3_124 = arith.constant 3 : index
    %c1_125 = arith.constant 1 : index
    %c0_126 = arith.constant 0 : index
    %148 = vector.load %arg10[%c3_124, %c1_125, %c0_126] : memref<4x2x128xf32, #tpu.memory_space<vmem>>, vector<1x1x128xf32>
    %149 = vector.shape_cast %148 : vector<1x1x128xf32> to vector<1x128xf32>
    %150 = vector.broadcast %147 : vector<128x1xf32> to vector<128x128xf32>
    %151 = vector.broadcast %149 : vector<1x128xf32> to vector<128x128xf32>
    %152 = arith.mulf %150, %151 : vector<128x128xf32>
    %153 = arith.addf %139, %152 : vector<128x128xf32>
    %154 = vector.shape_cast %146 : vector<8x128xf32> to vector<1x8x128xf32>
    %155 = vector.shape_cast %153 : vector<128x128xf32> to vector<1x128x128xf32>
    "tpu.trace_start"() <{level = 10 : i32, message = "bsd,btd->bst"}> : () -> ()
    %cst_127 = arith.constant dense<0.000000e+00> : vector<1x8x128xf32>
    %156 = tpu.matmul %154, %155, %cst_127 {dimension_numbers = #tpu.dot_dimension_numbers<[2], [2], [1], [1], [0, 0, 0, 1, 1, 1], [0], [0]>} : vector<1x8x128xf32>, vector<1x128x128xf32>, vector<1x8x128xf32> -> vector<1x8x128xf32>
    "tpu.trace_stop"() : () -> ()
    %c0_128 = arith.constant 0 : index
    %c24 = arith.constant 24 : index
    %c0_129 = arith.constant 0 : index
    %157 = vector.load %arg11[%c0_128, %c24, %c0_129] : memref<1x32x128xf32, #tpu.memory_space<vmem>>, vector<1x8x128xf32>
    tpu.vector_store %arg11[%c0_128, %c24, %c0_129], %156 {strides = array<i32>} : memref<1x32x128xf32, #tpu.memory_space<vmem>>, vector<1x8x128xf32>,
    return
  }
  func.func @transform_0(%arg0: i32) -> (i32, i32, i32) {
    %c0_i32 = arith.constant 0 : i32
    %c0_i32_0 = arith.constant 0 : i32
    %c0_i32_1 = arith.constant 0 : i32
    return %arg0, %c0_i32, %c0_i32_0 : i32, i32, i32
  }
  func.func @transform_1(%arg0: i32) -> (i32, i32, i32) {
    %c0_i32 = arith.constant 0 : i32
    %c0_i32_0 = arith.constant 0 : i32
    %c0_i32_1 = arith.constant 0 : i32
    return %arg0, %c0_i32, %c0_i32_0 : i32, i32, i32
  }
  func.func @transform_2(%arg0: i32) -> (i32, i32) {
    %c0_i32 = arith.constant 0 : i32
    %c0_i32_0 = arith.constant 0 : i32
    %c0_i32_1 = arith.constant 0 : i32
    return %c0_i32, %c0_i32_0 : i32, i32
  }
  func.func @transform_3(%arg0: i32) -> (i32, i32) {
    %c0_i32 = arith.constant 0 : i32
    %c0_i32_0 = arith.constant 0 : i32
    %c0_i32_1 = arith.constant 0 : i32
    return %c0_i32, %c0_i32_0 : i32, i32
  }
  func.func @transform_4(%arg0: i32) -> (i32, i32) {
    %c0_i32 = arith.constant 0 : i32
    %c0_i32_0 = arith.constant 0 : i32
    %c0_i32_1 = arith.constant 0 : i32
    return %c0_i32, %c0_i32_0 : i32, i32
  }
  func.func @transform_5(%arg0: i32) -> (i32, i32) {
    %c0_i32 = arith.constant 0 : i32
    %c0_i32_0 = arith.constant 0 : i32
    %c0_i32_1 = arith.constant 0 : i32
    return %c0_i32, %c0_i32_0 : i32, i32
  }
  func.func @transform_6(%arg0: i32) -> (i32, i32) {
    %c0_i32 = arith.constant 0 : i32
    %c0_i32_0 = arith.constant 0 : i32
    %c0_i32_1 = arith.constant 0 : i32
    return %c0_i32, %c0_i32_0 : i32, i32
  }
  func.func @transform_7(%arg0: i32) -> (i32, i32) {
    %c0_i32 = arith.constant 0 : i32
    %c0_i32_0 = arith.constant 0 : i32
    %c0_i32_1 = arith.constant 0 : i32
    return %c0_i32, %c0_i32_0 : i32, i32
  }
  func.func @transform_8(%arg0: i32) -> (i32, i32, i32) {
    %c0_i32 = arith.constant 0 : i32
    %c0_i32_0 = arith.constant 0 : i32
    %c0_i32_1 = arith.constant 0 : i32
    %c0_i32_2 = arith.constant 0 : i32
    return %c0_i32, %c0_i32_0, %c0_i32_1 : i32, i32, i32
  }
  func.func @transform_9(%arg0: i32) -> (i32, i32, i32) {
    %c0_i32 = arith.constant 0 : i32
    %c0_i32_0 = arith.constant 0 : i32
    %c0_i32_1 = arith.constant 0 : i32
    %c0_i32_2 = arith.constant 0 : i32
    return %c0_i32, %c0_i32_0, %c0_i32_1 : i32, i32, i32
  }
  func.func @transform_10(%arg0: i32) -> (i32, i32, i32) {
    %c0_i32 = arith.constant 0 : i32
    %c0_i32_0 = arith.constant 0 : i32
    %c0_i32_1 = arith.constant 0 : i32
    return %arg0, %c0_i32, %c0_i32_0 : i32, i32, i32
  }
}

</mosaic_0001>

<bundles_post_ra>
// kernel: tpu_custom_call.1
= control target key start
LH: loop header
LB: loop body
LE: loop exit
PB: predicated region body
PF: predicated region fallthrough
CT: control target
= control target key end

     0   :  { %s5451_s0 = inlined_call_operand.hbm [shape: f32[2,8,128], index: 0, kind: input, shape index: {}]   ;;  %s5452_s1 = inlined_call_operand.hbm [shape: f32[2,128,128], index: 1, kind: input, shape index: {}]   ;;  %s5453_s2 = inlined_call_operand.hbm [shape: f32[128,128], index: 2, kind: input, shape index: {}]   ;;  %s5454_s3 = inlined_call_operand.hbm [shape: f32[1,128], index: 3, kind: input, shape index: {}]   ;;  %s5455_s4 = inlined_call_operand.hbm [shape: f32[128,128], index: 4, kind: input, shape index: {}]   ;;  %s5456_s5 = inlined_call_operand.hbm [shape: f32[1,128], index: 5, kind: input, shape index: {}]   ;;  %s5457_s6 = inlined_call_operand.hbm [shape: f32[128,128], index: 6, kind: input, shape index: {}]   ;;  %s5458_s7 = inlined_call_operand.hbm [shape: f32[128,128], index: 7, kind: input, shape index: {}]   ;;  %s5459_s8 = inlined_call_operand.hbm [shape: f32[4,2,128], index: 8, kind: input, shape index: {}]   ;;  %s5460_s9 = inlined_call_operand.hbm [shape: f32[4,2,128], index: 9, kind: input, shape index: {}]   ;;  %s5461_s10 = inlined_call_operand.hbm [shape: f32[2,32,128], index: 10, kind: output, shape index: {}]  }
   0x1   :  { %5504 = sst [smem:[#allocation55_spill]] %s5451_s0 }
   0x2   :  { %5505 = sst [smem:[#allocation56_spill]] %s5453_s2 }
   0x3   :  { %5506 = sst [smem:[#allocation57_spill]] %s5454_s3 }
   0x4   :  { %5507 = sst [smem:[#allocation58_spill]] %s5455_s4 }
   0x5   :  { %5508 = sst [smem:[#allocation59_spill]] %s5456_s5 }
   0x6   :  { %5509 = sst [smem:[#allocation60_spill]] %s5461_s10 }
   0x7   :  { %15 = vsyncpa [#allocation7], 0 }
   0x8   :  { %17 = vsyncpa [#allocation7 + $0x1], 0 }
   0x9   :  { %18 = vsyncpa [#allocation10], 0 }
   0xa   :  { %20 = vsyncpa [#allocation10 + $0x1], 0 }
   0xb   :  { %21 = vsyncpa [#allocation13], 0 }
   0xc   :  { %22 = vsyncpa [#allocation16], 0 }
   0xd   :  { %23 = vsyncpa [#allocation19], 0 }
   0xe   :  { %24 = vsyncpa [#allocation22], 0 }
   0xf   :  { %25 = vsyncpa [#allocation8], 0 }
  0x10   :  { %27 = vsyncpa [#allocation8 + $0x1], 0  ;;  %s4146_s13 = smov 0   ;;  %s4148_s14 = smov 0  }
  0x11   :  { %s4150_s15 = smov 0   ;;  %s4152_s16 = smov 0  }
  0x12 LB: > { %s4063_s17 = smov [#allocation11]   ;;  %s4167_s19 = sadd.s32 4294967295, %s4061_s16   ;;  %s4061_s16 = sphi %s4152_s16, %s5606_s16   ;;  %s4057_s15 = sphi %s4150_s15, %s5605_s15   ;;  %s4053_s14 = sphi %s4148_s14, %s5604_s14   ;;  %s4049_s13 = sphi %s4146_s13, %s5603_s13  }
  0x13   : > { %s296_s18 = sshll.u32 %s4063_s17, 4  ;;  %p2663_p0 = scmp.ge.s32.totalorder %s4061_s16, 1  ;;  %s4172_s18 = int_to_ptr.vmem [resolvable:$true] %s296_s18 }
  0x14   : > { %p5466_p1 = scmp.eq.s32.totalorder %s4167_s19, 0  ;;  %p284_p2 = scmp.lt.s32.totalorder %s4061_s16, 3 }
  0x15   : > { %s4064_s21 = smov [#allocation12]   ;;  %s4065_s24 = smov [#allocation15]  }
  0x16   : > { %p4174_p3 = pnand %p2663_p0, %p284_p2  ;;  %s310_s22 = sshll.u32 %s4064_s21, 4  ;;  %s4187_s22 = int_to_ptr.vmem [resolvable:$true] %s310_s22 }
  0x17   : > { %s334_s25 = sshll.u32 %s4065_s24, 4  ;;  %s5513_s2 = sld [smem:[#allocation56_spill]]  ;;  %s4189_s25 = int_to_ptr.vmem [resolvable:$true] %s334_s25 }
  0x18   : > { %s5510_s20 = scalar_select %p4174_p3, 1, 0 }
  0x19   : > { %p3449_p5 = pneg %p4174_p3 }
  0x1a   : > { %5511 = sst [smem:[#allocation32_spill]] %s5510_s20 }
  0x1b   : > { %p4183_p6 = pnand %p3449_p5, %p5466_p1 }
  0x1d   : > { %s3687_s28 = scalar_lea.hbm %s5513_s2, 2048  ;;  %p4199_p8 = pneg %p4183_p6 }
  0x1e   : > { %p3688_p7 = scmp.ne.s32.totalorder %s5513_s2, %s3687_s28  ;;  %p3694_p11 = scmp.lt.u32.totalorder %s3687_s28, %s5513_s2 }
  0x20   : > { %p3690_p9 = pnand %p4199_p8, %p3688_p7 }
  0x22   : > { %p3691_p10 = pneg %p3690_p9 }
  0x24   : > { %p3696_p12 = pnand %p3694_p11, %p3691_p10 }
  0x26   : > { %3699 = shalt.err (!%p3696_p12)
}
  0x27   : > { %s3700_s21 = scalar_lea.vmem %s4172_s18, 2048  ;;  %p3708_p5 = scmp.lt.s32.totalorder %s4172_s18, %s4172_s18 }
  0x28   : > { %p3701_p13 = scmp.ne.s32.totalorder %s4172_s18, %s3700_s21  ;;  %p3709_p4 = scmp.lt.s32.totalorder %s3700_s21, %s3700_s21 }
  0x2a   : > { %p3703_p0 = pnand %p3701_p13, %p4199_p8  ;;  %p3710_p7 = por %p3709_p4, %p3708_p5 }
  0x2c   : > { %p3704_p2 = pneg %p3703_p0 }
  0x2e   : > { %p3711_p9 = pnand %p3710_p7, %p3704_p2 }
  0x30   : > { %3714 = shalt.err (!%p3711_p9)
}
  0x31   : > { %s5464_s24 = smov 128   ;;  %s5468_s26 = smov 8  }
  0x32   : > { %3452 = dma.hbm_to_vmem [thread:$0]  (!%p4183_p6), %s5513_s2, 2048, %s4172_s18, [#allocation10], %s5464_s24, %s5464_s24, %s5468_s26  }
  0x33   : > { %s5515_s3 = sld [smem:[#allocation57_spill]] }
  0x39   : > { %s3715_s12 = scalar_lea.hbm %s5515_s3, 16 }
  0x3a   : > { %p3716_p4 = scmp.ne.s32.totalorder %s5515_s3, %s3715_s12  ;;  %p3722_p12 = scmp.lt.u32.totalorder %s3715_s12, %s5515_s3 }
  0x3c   : > { %p3718_p10 = pnand %p3716_p4, %p4199_p8 }
  0x3e   : > { %p3719_p11 = pneg %p3718_p10 }
  0x40   : > { %p3724_p13 = pnand %p3722_p12, %p3719_p11 }
  0x42   : > { %3727 = shalt.err (!%p3724_p13)
}
  0x43   : > { %s3728_s18 = scalar_lea.vmem %s4187_s22, 16  ;;  %s3735_s27 = scalar_lea.vmem %s4187_s22, 32 }
  0x44   : > { %p3729_p0 = scmp.ne.s32.totalorder %s4187_s22, %s3728_s18  ;;  %p3736_p7 = scmp.lt.s32.totalorder %s4187_s22, %s4187_s22 }
  0x45   : > { %p3737_p9 = scmp.lt.s32.totalorder %s3735_s27, %s3728_s18 }
  0x46   : > { %p3731_p2 = pnand %p3729_p0, %p4199_p8 }
  0x47   : > { %p3738_p4 = por %p3737_p9, %p3736_p7 }
  0x48   : > { %p3732_p5 = pneg %p3731_p2 }
  0x4a   : > { %p3739_p10 = pnand %p3738_p4, %p3732_p5 }
  0x4c   : > { %3742 = shalt.err (!%p3739_p10)
}
  0x4d   : > { %3455 = dma.hbm_to_vmem [thread:$0]  (!%p4183_p6), %s5515_s3, 16, %s4187_s22, [#allocation13]  }
  0x4e   : > { %s5516_s5 = sld [smem:[#allocation59_spill]] }
  0x54   : > { %s3743_s30 = scalar_lea.hbm %s5516_s5, 16 }
  0x55   : > { %p3744_p11 = scmp.ne.s32.totalorder %s5516_s5, %s3743_s30  ;;  %p3750_p0 = scmp.lt.u32.totalorder %s3743_s30, %s5516_s5 }
  0x57   : > { %p3746_p12 = pnand %p3744_p11, %p4199_p8 }
  0x59   : > { %p3747_p13 = pneg %p3746_p12 }
  0x5b   : > { %p3752_p2 = pnand %p3750_p0, %p3747_p13 }
  0x5d   : > { %3755 = shalt.err (!%p3752_p2)
}
  0x5e   : > { %s3756_s22 = scalar_lea.vmem %s4189_s25, 16  ;;  %s3763_s27 = scalar_lea.vmem %s4189_s25, 32 }
  0x5f   : > { %p3757_p5 = scmp.ne.s32.totalorder %s4189_s25, %s3756_s22  ;;  %p3764_p4 = scmp.lt.s32.totalorder %s4189_s25, %s4189_s25 }
  0x60   : > { %p3765_p10 = scmp.lt.s32.totalorder %s3763_s27, %s3756_s22 }
  0x61   : > { %p3759_p7 = pnand %p3757_p5, %p4199_p8 }
  0x62   : > { %p3766_p11 = por %p3765_p10, %p3764_p4 }
  0x63   : > { %p3760_p9 = pneg %p3759_p7 }
  0x65   : > { %p3767_p12 = pnand %p3766_p11, %p3760_p9 }
  0x67   : > { %3770 = shalt.err (!%p3767_p12)
}
  0x68   : > { %3461 = dma.hbm_to_vmem [thread:$0]  (!%p4183_p6), %s5516_s5, 16, %s4189_s25, [#allocation16]  }
  0x69   : > { %s4068_s28 = smov [#allocation18]   ;;  %s4069_s30 = smov [#allocation14]  }
  0x6a   : > { %s357_s29 = sshll.u32 %s4068_s28, 4  ;;  %s320_s12 = sshll.u32 %s4069_s30, 4  ;;  %s358_s29 = int_to_ptr.vmem [resolvable:$true] %s357_s29  ;;  %s321_s12 = int_to_ptr.vmem [resolvable:$true] %s320_s12 }
  0x6b   : > { %s3771_s18 = scalar_lea.hbm %s5458_s7, 2048 }
  0x6c   : > { %p3772_p13 = scmp.ne.s32.totalorder %s5458_s7, %s3771_s18  ;;  %p3778_p5 = scmp.lt.u32.totalorder %s3771_s18, %s5458_s7 }
  0x6e   : > { %p3774_p0 = pnand %p3772_p13, %p4199_p8 }
  0x70   : > { %p3775_p2 = pneg %p3774_p0 }
  0x72   : > { %p3780_p7 = pnand %p3778_p5, %p3775_p2 }
  0x74   : > { %3783 = shalt.err (!%p3780_p7)
}
  0x75   : > { %s3784_s25 = scalar_lea.vmem %s358_s29, 2048  ;;  %p3792_p11 = scmp.lt.s32.totalorder %s358_s29, %s358_s29 }
  0x76   : > { %p3785_p9 = scmp.ne.s32.totalorder %s358_s29, %s3784_s25  ;;  %p3793_p12 = scmp.lt.s32.totalorder %s3784_s25, %s3784_s25 }
  0x78   : > { %p3787_p4 = pnand %p3785_p9, %p4199_p8  ;;  %p3794_p1 = por %p3793_p12, %p3792_p11 }
  0x7a   : > { %p3788_p10 = pneg %p3787_p4 }
  0x7c   : > { %p3795_p3 = pnand %p3794_p1, %p3788_p10 }
  0x7e   : > { %3798 = shalt.err (!%p3795_p3)
}
  0x7f   : > { %s5517_s20 = smov 128   ;;  %s5518_s4 = sld [smem:[#allocation58_spill]] }
  0x80   : > { %3467 = dma.hbm_to_vmem [thread:$0]  (!%p4183_p6), %s5458_s7, 2048, %s358_s29, [#allocation19], %s5517_s20, %s5517_s20, %s5468_s26  }
  0x85   : > { %s3799_s21 = scalar_lea.hbm %s5518_s4, 2048 }
  0x86   : > { %p3800_p1 = scmp.ne.s32.totalorder %s5518_s4, %s3799_s21  ;;  %p3806_p0 = scmp.lt.u32.totalorder %s3799_s21, %s5518_s4 }
  0x88   : > { %p3802_p3 = pnand %p3800_p1, %p4199_p8 }
  0x8a   : > { %p3803_p13 = pneg %p3802_p3 }
  0x8c   : > { %p3808_p2 = pnand %p3806_p0, %p3803_p13 }
  0x8e   : > { %3811 = shalt.err (!%p3808_p2)
}
  0x8f   : > { %s3812_s25 = scalar_lea.vmem %s321_s12, 2048  ;;  %p3820_p4 = scmp.lt.s32.totalorder %s321_s12, %s321_s12 }
  0x90   : > { %p3813_p5 = scmp.ne.s32.totalorder %s321_s12, %s3812_s25  ;;  %p3821_p10 = scmp.lt.s32.totalorder %s3812_s25, %s3812_s25 }
  0x92   : > { %p3815_p7 = pnand %p3813_p5, %p4199_p8  ;;  %p3822_p11 = por %p3821_p10, %p3820_p4 }
  0x94   : > { %p3816_p9 = pneg %p3815_p7 }
  0x96   : > { %p3823_p12 = pnand %p3822_p11, %p3816_p9 }
  0x98   : > { %3826 = shalt.err (!%p3823_p12)
}
  0x99   : > { %3458 = dma.hbm_to_vmem [thread:$0]  (!%p4183_p6), %s5518_s4, 2048, %s321_s12, [#allocation13], %s5517_s20, %s5517_s20, %s5468_s26  }
  0x9a   : > { %s4070_s28 = smov [#allocation17]   ;;  %s4071_s17 = smov [#allocation20]  }
  0x9b   : > { %s344_s30 = sshll.u32 %s4070_s28, 4  ;;  %s370_s21 = sshll.u32 %s4071_s17, 4  ;;  %s345_s30 = int_to_ptr.vmem [resolvable:$true] %s344_s30  ;;  %s371_s21 = int_to_ptr.vmem [resolvable:$true] %s370_s21 }
  0x9c   : > { %s3827_s27 = scalar_lea.hbm %s5457_s6, 2048 }
  0x9d   : > { %p3828_p1 = scmp.ne.s32.totalorder %s5457_s6, %s3827_s27  ;;  %p3834_p0 = scmp.lt.u32.totalorder %s3827_s27, %s5457_s6 }
  0x9f   : > { %p3830_p3 = pnand %p3828_p1, %p4199_p8 }
  0xa1   : > { %p3831_p13 = pneg %p3830_p3 }
  0xa3   : > { %p3836_p2 = pnand %p3834_p0, %p3831_p13 }
  0xa5   : > { %3839 = shalt.err (!%p3836_p2)
}
  0xa6   : > { %s3840_s12 = scalar_lea.vmem %s345_s30, 2048  ;;  %p3848_p4 = scmp.lt.s32.totalorder %s345_s30, %s345_s30 }
  0xa7   : > { %p3841_p5 = scmp.ne.s32.totalorder %s345_s30, %s3840_s12  ;;  %p3849_p10 = scmp.lt.s32.totalorder %s3840_s12, %s3840_s12 }
  0xa9   : > { %p3843_p7 = pnand %p3841_p5, %p4199_p8  ;;  %p3850_p11 = por %p3849_p10, %p3848_p4 }
  0xab   : > { %p3844_p9 = pneg %p3843_p7 }
  0xad   : > { %p3851_p12 = pnand %p3850_p11, %p3844_p9 }
  0xaf   : > { %3854 = shalt.err (!%p3851_p12)
}
  0xb0   : > { %3464 = dma.hbm_to_vmem [thread:$0]  (!%p4183_p6), %s5457_s6, 2048, %s345_s30, [#allocation16], %s5517_s20, %s5517_s20, %s5468_s26  }
  0xb1   : > { %s3855_s18 = scalar_lea.hbm %s5459_s8, 128 }
  0xb2   : > { %p3856_p1 = scmp.ne.s32.totalorder %s5459_s8, %s3855_s18  ;;  %p3862_p0 = scmp.lt.u32.totalorder %s3855_s18, %s5459_s8 }
  0xb4   : > { %p3858_p3 = pnand %p3856_p1, %p4199_p8 }
  0xb6   : > { %p3859_p13 = pneg %p3858_p3 }
  0xb8   : > { %p3864_p2 = pnand %p3862_p0, %p3859_p13 }
  0xba   : > { %3867 = shalt.err (!%p3864_p2)
}
  0xbb   : > { %s3868_s29 = scalar_lea.vmem %s371_s21, 128  ;;  %p3876_p4 = scmp.lt.s32.totalorder %s371_s21, %s371_s21 }
  0xbc   : > { %p3869_p5 = scmp.ne.s32.totalorder %s371_s21, %s3868_s29  ;;  %p3877_p10 = scmp.lt.s32.totalorder %s3868_s29, %s3868_s29 }
  0xbe   : > { %p3871_p7 = pnand %p3869_p5, %p4199_p8  ;;  %p3878_p11 = por %p3877_p10, %p3876_p4 }
  0xc0   : > { %p3872_p9 = pneg %p3871_p7 }
  0xc2   : > { %p3879_p12 = pnand %p3878_p11, %p3872_p9 }
  0xc4   : > { %3882 = shalt.err (!%p3879_p12)
}
  0xc5   : > { %s4072_s30 = smov 32   ;;  %s4073_s12 = smov 2  }
  0xc6   : > { %3470 = dma.hbm_to_vmem [thread:$0]  (!%p4183_p6), %s5459_s8, 128, %s371_s21, [#allocation19], %s4072_s30, %s4072_s30, %s4073_s12  }
  0xc7   : > { %s4074_s28 = smov [#allocation21]   ;;  %s3883_s27 = scalar_lea.hbm %s5460_s9, 128 }
  0xc8   : > { %s383_s17 = sshll.u32 %s4074_s28, 4  ;;  %p3884_p1 = scmp.ne.s32.totalorder %s5460_s9, %s3883_s27  ;;  %s384_s17 = int_to_ptr.vmem [resolvable:$true] %s383_s17 }
  0xc9   : > { %p3890_p0 = scmp.lt.u32.totalorder %s3883_s27, %s5460_s9 }
  0xca   : > { %p3886_p3 = pnand %p3884_p1, %p4199_p8 }
  0xcc   : > { %p3887_p13 = pneg %p3886_p3 }
  0xce   : > { %p3892_p2 = pnand %p3890_p0, %p3887_p13 }
  0xd0   : > { %3895 = shalt.err (!%p3892_p2)
}
  0xd1   : > { %s3896_s21 = scalar_lea.vmem %s384_s17, 128  ;;  %p3904_p4 = scmp.lt.s32.totalorder %s384_s17, %s384_s17 }
  0xd2   : > { %p3897_p5 = scmp.ne.s32.totalorder %s384_s17, %s3896_s21  ;;  %p3905_p10 = scmp.lt.s32.totalorder %s3896_s21, %s3896_s21 }
  0xd4   : > { %p3899_p7 = pnand %p3897_p5, %p4199_p8  ;;  %p3906_p11 = por %p3905_p10, %p3904_p4 }
  0xd6   : > { %p3900_p9 = pneg %p3899_p7 }
  0xd8   : > { %p3907_p12 = pnand %p3906_p11, %p3900_p9 }
  0xda   : > { %3910 = shalt.err (!%p3907_p12)
}
  0xdb   : > { %3473 = dma.hbm_to_vmem [thread:$0]  (!%p4183_p6), %s5460_s9, 128, %s384_s17, [#allocation22], %s4072_s30, %s4072_s30, %s4073_s12  }
  0xdc   : > { %s2662_s11 = sadd.s32 4294967294, %s4061_s16   ;;  %s4372_s23 = sadd.s32 1, %s4061_s16  }
  0xdd   : > { %s37_s26 = ssub.s32 %s4061_s16, %s4372_s23  ;;  %s40_s28 = sadd.s32 1, %s4057_s15 }
  0xde   : > { %p38_p8 = scmp.eq.s32.totalorder %s37_s26, 0  ;;  %p47_p1 = scmp.ne.s32.totalorder %s4057_s15, %s4053_s14 }
  0xdf   : > { %p48_p3 = scmp.eq.s32.totalorder %s4061_s16, 0  ;;  %p53_p13 = scmp.ne.s32.totalorder %s4053_s14, %s4049_s13 }
  0xe0   : > { %s4383_s18 = scalar_select %p38_p8, %s4057_s15, %s40_s28  }
  0xe1   : > { %p4385_p0 = por %p48_p3, %p47_p1  ;;  %p5520_p2 = scmp.eq.s32.totalorder %s4167_s19, 0 }
  0xe2   : > { %p271_p5 = scmp.eq.s32.totalorder %s4167_s19, 1  ;;  %p277_p7 = scmp.eq.s32.totalorder %s2662_s11, 1 }
  0xe3   : > { %p4391_p6 = por %p5520_p2, %p53_p13  ;;  %p3493_p9 = scmp.lt.s32.totalorder %s4061_s16, 2 }
  0xe4   : > { %s4398_s12 = sand.u32 1, %s4057_s15   ;;  %p4400_p4 = por %p271_p5, %p47_p1 }
  0xe5   : > { %p4404_p10 = por %p277_p7, %p53_p13  ;;  %s2673_s10 = sshll.u32 %s4398_s12, 3 }
  0xe6   : > { %s5522_s17 = scalar_select %p4400_p4, 1, 0 }
  0xe7   : > { %s5523_s27 = scalar_select %p4404_p10, 1, 0 }
  0xe8   : > { %s2674_s25 = sshll.u32 %s4061_s16, 7  ;;  %s5524_s0 = sld [smem:[#allocation55_spill]] }
  0xe9   : > { %s401_s24 = scalar_lea.vmem [#allocation6], %s2673_s10  ;;  %p4419_p11 = pnand %p3493_p9, %p4385_p0 }
  0xea   : > { %s408_s11 = sshll.u32 %s401_s24, 4  ;;  %s2675_s28 = sshll.u32 %s4398_s12, 7  ;;  %s4415_s11 = int_to_ptr.vmem [resolvable:$true] %s408_s11 }
  0xeb   : > { %s398_s29 = scalar_lea.sflag [#allocation7], %s4398_s12  ;;  %p3913_p8 = pneg %p4419_p11 }
  0xee   : > { %s4413_s2 = scalar_lea.hbm %s5524_s0, %s2674_s25  ;;  %s3916_s22 = scalar_lea.hbm %s5524_s0, 256 }
  0xef   : > { %s3911_s25 = scalar_lea.hbm %s4413_s2, 128  ;;  %p3917_p13 = scmp.lt.u32.totalorder %s4413_s2, %s5524_s0 }
  0xf0   : > { %p3912_p12 = scmp.ne.s32.totalorder %s4413_s2, %s3911_s25  ;;  %p3918_p0 = scmp.lt.u32.totalorder %s3916_s22, %s3911_s25 }
  0xf1   : > { %p3920_p5 = scmp.lt.u32.totalorder %s3911_s25, %s4413_s2 }
  0xf2   : > { %p3914_p1 = pnand %p3913_p8, %p3912_p12  ;;  %p3919_p2 = por %p3918_p0, %p3917_p13 }
  0xf4   : > { %p3915_p3 = pneg %p3914_p1  ;;  %p3921_p7 = por %p3920_p5, %p3919_p2 }
  0xf6   : > { %p3922_p9 = pnand %p3921_p7, %p3915_p3 }
  0xf8   : > { %3925 = shalt.err (!%p3922_p9)
}
  0xf9   : > { %s3926_s3 = scalar_lea.vmem %s4415_s11, 128  ;;  %s4075_s10 = smov [#allocation6]  }
  0xfa   : > { %p3927_p12 = scmp.ne.s32.totalorder %s4415_s11, %s3926_s3  ;;  %s3931_s21 = sshll.u32 %s4075_s10, 4  ;;  %s3932_s21 = int_to_ptr.vmem [resolvable:$false] %s3931_s21 }
  0xfb   : > { %s3933_s4 = scalar_lea.vmem %s3932_s21, 256  ;;  %p3934_p4 = scmp.lt.s32.totalorder %s4415_s11, %s3932_s21 }
  0xfc   : > { %p3929_p1 = pnand %p3927_p12, %p3913_p8  ;;  %p3935_p13 = scmp.lt.s32.totalorder %s3933_s4, %s3926_s3 }
  0xfe   : > { %p3930_p10 = pneg %p3929_p1  ;;  %p3936_p0 = por %p3935_p13, %p3934_p4 }
 0x100   : > { %p3937_p2 = pnand %p3936_p0, %p3930_p10 }
 0x102   : > { %3940 = shalt.err (!%p3937_p2)
}
 0x103   : > { %3477 = dma.hbm_to_vmem [thread:$0]  (!%p4419_p11), %s4413_s2, 128, %s4415_s11, %s398_s29  }
 0x104   : > { %s419_s25 = scalar_lea.vmem [#allocation9], %s2675_s28  ;;  %s2713_s24 = sshll.u32 %s4061_s16, 11 }
 0x105   : > { %s426_s22 = sshll.u32 %s419_s25, 4  ;;  %s4459_s21 = scalar_lea.hbm %s5452_s1, %s2713_s24  ;;  %s4453_s22 = int_to_ptr.vmem [resolvable:$true] %s426_s22 }
 0x106   : > { %s5526_s4 = sand.u32 1, %s4061_s16   ;;  %s3941_s5 = scalar_lea.hbm %s4459_s21, 2048 }
 0x107   : > { %s4463_s0 = scalar_lea.sflag [#allocation10], %s5526_s4  ;;  %p3942_p4 = scmp.ne.s32.totalorder %s4459_s21, %s3941_s5 }
 0x108   : > { %s3946_s11 = scalar_lea.hbm %s5452_s1, 4096  ;;  %p3947_p5 = scmp.lt.u32.totalorder %s4459_s21, %s5452_s1 }
 0x109   : > { %p3944_p10 = pnand %p3942_p4, %p3913_p8  ;;  %p3948_p7 = scmp.lt.u32.totalorder %s3946_s11, %s3941_s5 }
 0x10a   : > { %p3950_p12 = scmp.lt.u32.totalorder %s3941_s5, %s4459_s21 }
 0x10b   : > { %p3945_p3 = pneg %p3944_p10  ;;  %p3949_p9 = por %p3948_p7, %p3947_p5 }
 0x10d   : > { %p3951_p1 = por %p3950_p12, %p3949_p9 }
 0x10f   : > { %p3952_p13 = pnand %p3951_p1, %p3945_p3 }
 0x111   : > { %3955 = shalt.err (!%p3952_p13)
}
 0x112   : > { %s3956_s25 = scalar_lea.vmem %s4453_s22, 2048  ;;  %s4076_s24 = smov [#allocation9]  }
 0x113   : > { %p3957_p0 = scmp.ne.s32.totalorder %s4453_s22, %s3956_s25  ;;  %s3961_s10 = sshll.u32 %s4076_s24, 4  ;;  %s3962_s10 = int_to_ptr.vmem [resolvable:$false] %s3961_s10 }
 0x114   : > { %s3963_s3 = scalar_lea.vmem %s3962_s10, 4096  ;;  %p3964_p10 = scmp.lt.s32.totalorder %s4453_s22, %s3962_s10 }
 0x115   : > { %p3959_p2 = pnand %p3957_p0, %p3913_p8  ;;  %p3965_p5 = scmp.lt.s32.totalorder %s3963_s3, %s3956_s25 }
 0x117   : > { %p3960_p4 = pneg %p3959_p2  ;;  %p3966_p7 = por %p3965_p5, %p3964_p10 }
 0x119   : > { %p3967_p9 = pnand %p3966_p7, %p3960_p4 }
 0x11b   : > { %3970 = shalt.err (!%p3967_p9)
}
 0x11c   : > { %s5527_s5 = smov 8   ;;  %s5528_s4 = sld [smem:[#allocation32_spill]] }
 0x11d   : > { %3480 = dma.hbm_to_vmem [thread:$0]  (!%p4419_p11), %s4459_s21, 2048, %s4453_s22, %s4463_s0, %s5517_s20, %s5517_s20, %s5527_s5  }
 0x122   : > { %p5529_p8 = scmp.ne.s32.totalorder %s5528_s4, 0 }
 0x124   : > { %438 = sbr.rel (%p5529_p8) target bundleno = 1370 (0x55a), region = 60 }
 0x12b   : > { %s4495_s12 = sand.u32 1, %s4053_s14  }
 0x12c   : > { %s2679_s2 = sshll.u32 %s4495_s12, 3  ;;  %s441_s11 = scalar_lea.sflag [#allocation7], %s4495_s12 }
 0x12d   : > { %s4499_s28 = scalar_lea.vmem [#allocation6], %s2679_s2 }
 0x12e   : > { %4016 = dma.done.wait (%p4391_p6), %s441_s11, 128  }
 0x12f   : > { %4018 = vsyncadd (%p4391_p6), %s441_s11, 4294967168  ;;  %s449_s0 = sand.u32 1, %s4167_s19   ;;  %s2680_s20 = sshll.u32 %s4495_s12, 7 }
 0x130   : > { %s450_s26 = scalar_lea.sflag [#allocation10], %s449_s0  ;;  %s4507_s22 = scalar_lea.vmem [#allocation9], %s2680_s20 }
 0x131   : > { %4020 = dma.done.wait (%p4391_p6), %s450_s26, 2048  }
 0x132   : > { %4022 = vsyncadd (%p4391_p6), %s450_s26, 4294965248  ;;  %p5530_p11 = scmp.eq.s32.totalorder %s4167_s19, 0 }
 0x134   : > { %4024 = dma.done.wait (%p5530_p11), [#allocation10], 2048   ;;  %p5531_p3 = pmov %p5530_p11 }
 0x136   : > { %4026 = vsyncadd (%p5531_p3), [#allocation10], 4294965248  ;;  %p5532_p12 = pmov %p5531_p3 }
 0x137   : > { %p5533_p1 = pmov %p5531_p3 }
 0x138   : > { %4028 = dma.done.wait (%p5532_p12), [#allocation13], 2064  }
 0x139   : > { %4030 = vsyncadd (%p5533_p1), [#allocation13], 4294965232  ;;  %p5534_p13 = pmov %p5533_p1 }
 0x13a   : > { %p5535_p0 = pmov %p5533_p1 }
 0x13b   : > { %4032 = dma.done.wait (%p5534_p13), [#allocation16], 2064  }
 0x13c   : > { %4034 = vsyncadd (%p5535_p0), [#allocation16], 4294965232  ;;  %p5536_p6 = pmov %p5535_p0 }
 0x13d   : > { %p5537_p2 = pmov %p5535_p0 }
 0x13e   : > { %4036 = dma.done.wait (%p5536_p6), [#allocation19], 2176  }
 0x13f   : > { %4038 = vsyncadd (%p5537_p2), [#allocation19], 4294965120  ;;  %p5538_p4 = pmov %p5535_p0 }
 0x140   : > { %p5539_p10 = pmov %p5535_p0 }
 0x141   : > { %4040 = dma.done.wait (%p5538_p4), [#allocation22], 128  }
 0x142   : > { %4042 = vsyncadd (%p5539_p10), [#allocation22], 4294967168  ;;  %v5486_v0 = vmov 0.0|0.0   ;;  %vm4078_vm0 = vmmov 0   ;;  %v5470_v1 = vmov 0.0   ;;  %v544_v2 = vld [vmem:[#allocation11] sm:$0xff] }
 0x143   : > { %3203 = vmatprep.subr.bf16.mxu0 %v5486_v0  ;;  %2913 = vmatprep.mubr.msk.f32.mxu0 %vm4078_vm0, %v5470_v1  ;;  %v545_v3 = vld [vmem:[#allocation11 + $0x8] sm:$0xff]  ;;  %v546_v4 = vld [vmem:[#allocation11 + $0x10] sm:$0xff]  ;;  %v547_v6 = vld [vmem:[#allocation11 + $0x18] sm:$0xff]  ;;  %s2689_s30 = sshll.u32 %s4495_s12, 5  ;;  %s2714_s25 = sshll.u32 %s4167_s19, 9 }
 0x144   : > { %v3204_v5 = vpack.c.bf16 %v545_v3, %v544_v2  ;;  %v638_v7 = vld [vmem:[#allocation14] sm:$0xff]  ;;  %v639_v8 = vld [vmem:[#allocation14 + $0x8] sm:$0xff]  ;;  %v3207_v9 = vpack.c.bf16 %v547_v6, %v546_v4  ;;  %v640_v11 = vld [vmem:[#allocation14 + $0x10] sm:$0xff]  ;;  %s526_s21 = scalar_lea.vmem [#allocation23], %s2689_s30  ;;  %s5599_s3 = sld [smem:[#allocation60_spill]] }
 0x145   : > { %v3227_v10 = vpack.c.bf16 %v639_v8, %v638_v7  ;;  %v641_v12 = vld [vmem:[#allocation14 + $0x18] sm:$0xff]  ;;  %v549_v14 = vld [vmem:[#allocation11 + $0x28] sm:$0xff]  ;;  %v550_v19 = vld [vmem:[#allocation11 + $0x30] sm:$0xff]  ;;  %s2490_s29 = sshll.u32 %s526_s21, 4  ;;  %s2477_s4 = scalar_lea.sflag [#allocation8], %s4495_s12  ;;  %s5402_s29 = int_to_ptr.vmem [resolvable:$true] %s2490_s29 }
 0x146   : > { %3205 = vmatpush3.bf16.msra.mxu0 %v3204_v5  ;;  %v548_v13 = vld [vmem:[#allocation11 + $0x20] sm:$0xff]  ;;  %v3231_v15 = vpack.c.bf16 %v641_v12, %v640_v11  ;;  %v643_v17 = vld [vmem:[#allocation14 + $0x28] sm:$0xff]  ;;  %v551_v21 = vld [vmem:[#allocation11 + $0x38] sm:$0xff]  ;;  %s3971_s2 = scalar_lea.vmem %s5402_s29, 512  ;;  %p5600_p7 = scmp.ne.s32.totalorder %s5522_s17, 0 }
 0x147   : > { %3206 = vmatprep.subr.bf16.mxu0 %v5486_v0  ;;  %v642_v16 = vld [vmem:[#allocation14 + $0x20] sm:$0xff]  ;;  %3228 = vmatprep.subr.bf16.mxu1 %v3227_v10  ;;  %v3210_v18 = vpack.c.bf16 %v549_v14, %v548_v13  ;;  %v644_v22 = vld [vmem:[#allocation14 + $0x30] sm:$0xff]  ;;  %v645_v23 = vld [vmem:[#allocation14 + $0x38] sm:$0xff]  ;;  %v3213_v24 = vpack.c.bf16 %v551_v21, %v550_v19  ;;  %p3972_p5 = scmp.ne.s32.totalorder %s5402_s29, %s3971_s2  ;;  %s4088_s19 = smov [#allocation23]  }
 0x148   : > { %3230 = vmatpush3.bf16.msra.mxu1 %v3227_v10  ;;  %v3235_v20 = vpack.c.bf16 %v643_v17, %v642_v16  ;;  %v552_v25 = vld [vmem:[#allocation11 + $0x40] sm:$0xff]  ;;  %v553_v26 = vld [vmem:[#allocation11 + $0x48] sm:$0xff]  ;;  %v3239_v27 = vpack.c.bf16 %v645_v23, %v644_v22  ;;  %v554_v32 = vld [vmem:[#allocation11 + $0x50] sm:$0xff]  ;;  %s3975_s11 = sshll.u32 %s4088_s19, 4  ;;  %s3976_s11 = int_to_ptr.vmem [resolvable:$false] %s3975_s11 }
 0x149   : > { %3232 = vmatprep.subr.bf16.mxu1 %v3231_v15  ;;  %v646_v28 = vld [vmem:[#allocation14 + $0x40] sm:$0xff]  ;;  %v647_v29 = vld [vmem:[#allocation14 + $0x48] sm:$0xff]  ;;  %v3216_v31 = vpack.c.bf16 %v553_v26, %v552_v25  ;;  %v555_v34 = vld [vmem:[#allocation11 + $0x58] sm:$0xff]  ;;  %p3973_p9 = pnand %p3972_p5, %p5600_p7  ;;  %p3978_p11 = scmp.lt.s32.totalorder %s5402_s29, %s3976_s11 }
 0x14a   : > { %3208 = vmatpush3.bf16.msra.mxu0 %v3207_v9  ;;  %v4540_v30 = vld [vmem:[%s4507_s22] sm:$0xff]  ;;  %v3243_v33 = vpack.c.bf16 %v647_v29, %v646_v28  ;;  %v648_v35 = vld [vmem:[#allocation14 + $0x50] sm:$0xff]  ;;  %v3219_v37 = vpack.c.bf16 %v555_v34, %v554_v32  ;;  %v557_v40 = vld [vmem:[#allocation11 + $0x68] sm:$0xff]  ;;  %s5407_s5 = scalar_lea.hbm %s5599_s3, %s2714_s25 }
 0x14b   : > { %3209 = vmatprep.subr.bf16.mxu0 %v5486_v0  ;;  %2948 = vmatprep.mubr.f32.mxu1 %v4540_v30  ;;  %v649_v36 = vld [vmem:[#allocation14 + $0x58] sm:$0xff]  ;;  %v650_v41 = vld [vmem:[#allocation14 + $0x60] sm:$0xff]  ;;  %v651_v42 = vld [vmem:[#allocation14 + $0x68] sm:$0xff]  ;;  %p3974_p8 = pneg %p3973_p9 }
 0x14c   : > { %3234 = vmatpush3.bf16.msra.mxu1 %v3231_v15  ;;  %v556_v38 = vld [vmem:[#allocation11 + $0x60] sm:$0xff]  ;;  %v3247_v39 = vpack.c.bf16 %v649_v36, %v648_v35  ;;  %v558_v44 = vld [vmem:[#allocation11 + $0x70] sm:$0xff]  ;;  %v3251_v45 = vpack.c.bf16 %v651_v42, %v650_v41  ;;  %v559_v46 = vld [vmem:[#allocation11 + $0x78] sm:$0xff] }
 0x14d   : > { %3236 = vmatprep.subr.bf16.mxu1 %v3235_v20  ;;  %v3222_v43 = vpack.c.bf16 %v557_v40, %v556_v38  ;;  %v652_v47 = vld [vmem:[#allocation14 + $0x70] sm:$0xff]  ;;  %v653_v48 = vld [vmem:[#allocation14 + $0x78] sm:$0xff]  ;;  %v3225_v49 = vpack.c.bf16 %v559_v46, %v558_v44  ;;  %v822_v50 = vld [vmem:[#allocation17] sm:$0xff] }
 0x14e   : > { %3211 = vmatpush3.bf16.msra.mxu0 %v3210_v18  ;;  %v3255_v51 = vpack.c.bf16 %v653_v48, %v652_v47  ;;  %v823_v52 = vld [vmem:[#allocation17 + $0x8] sm:$0xff]  ;;  %v909_v53 = vld [vmem:[#allocation18] sm:$0xff]  ;;  %v824_v57 = vld [vmem:[#allocation17 + $0x10] sm:$0xff] }
 0x14f   : > { %3212 = vmatprep.subr.bf16.mxu0 %v5486_v0  ;;  %v910_v54 = vld [vmem:[#allocation18 + $0x8] sm:$0xff]  ;;  %v3260_v56 = vpack.c.bf16 %v823_v52, %v822_v50  ;;  %v825_v59 = vld [vmem:[#allocation17 + $0x18] sm:$0xff]  ;;  %v911_v60 = vld [vmem:[#allocation18 + $0x10] sm:$0xff] }
 0x150   : > { %3238 = vmatpush3.bf16.msra.mxu1 %v3235_v20  ;;  %v4548_v55 = vld [vmem:[%s4499_s28] sm:$0xff]  ;;  %v3283_v58 = vpack.c.bf16 %v910_v54, %v909_v53  ;;  %v4553_v62 = vld [vmem:[%s4507_s22 + $0x8] sm:$0xff]  ;;  %v3263_v63 = vpack.c.bf16 %v825_v59, %v824_v57  ;;  %v4567_v11 = vld [vmem:[%s4507_s22 + $0x20] sm:$0xff]  ;;  %v5484_v54 = vmov 0   ;;  %s3977_s28 = scalar_lea.vmem %s3976_s11, 1024 }
 0x151   : > { %3240 = vmatprep.subr.bf16.mxu1 %v3239_v27  ;;  %v912_v61 = vld [vmem:[#allocation18 + $0x18] sm:$0xff]  ;;  %v826_v2 = vld [vmem:[#allocation17 + $0x20] sm:$0xff]  ;;  %v4556_v3 = vld [vmem:[%s4507_s22 + $0x10] sm:$0xff]  ;;  %3560 = vset.pattern.permute.xlu0 %v5484_v54  ;;  %p3979_p3 = scmp.lt.s32.totalorder %s3977_s28, %s3971_s2 }
 0x152   : > { %3214 = vmatpush3.bf16.msra.mxu0 %v3213_v24  ;;  %v3287_v4 = vpack.c.bf16 %v912_v61, %v911_v60  ;;  %v827_v5 = vld [vmem:[#allocation17 + $0x28] sm:$0xff]  ;;  %v913_v6 = vld [vmem:[#allocation18 + $0x20] sm:$0xff]  ;;  %v4564_v8 = vld [vmem:[%s4507_s22 + $0x18] sm:$0xff] }
 0x153   : > { %3215 = vmatprep.subr.bf16.mxu0 %v5486_v0  ;;  %v914_v7 = vld [vmem:[#allocation18 + $0x28] sm:$0xff]  ;;  %v3266_v9 = vpack.c.bf16 %v827_v5, %v826_v2  ;;  %v828_v10 = vld [vmem:[#allocation17 + $0x30] sm:$0xff]  ;;  %v829_v13 = vld [vmem:[#allocation17 + $0x38] sm:$0xff]  ;;  %p3980_p12 = por %p3979_p3, %p3978_p11 }
 0x154   : > { %3242 = vmatpush3.bf16.msra.mxu1 %v3239_v27  ;;  %v3291_v12 = vpack.c.bf16 %v914_v7, %v913_v6  ;;  %v915_v14 = vld [vmem:[#allocation18 + $0x30] sm:$0xff]  ;;  %v916_v15 = vld [vmem:[#allocation18 + $0x38] sm:$0xff]  ;;  %v4573_v16 = vld [vmem:[%s4507_s22 + $0x28] sm:$0xff]  ;;  %v3269_v17 = vpack.c.bf16 %v829_v13, %v828_v10 }
 0x155   : > { %3244 = vmatprep.subr.bf16.mxu1 %v3243_v33  ;;  %v830_v18 = vld [vmem:[#allocation17 + $0x40] sm:$0xff]  ;;  %v4576_v19 = vld [vmem:[%s4507_s22 + $0x30] sm:$0xff]  ;;  %v3295_v20 = vpack.c.bf16 %v916_v15, %v915_v14  ;;  %v4582_v24 = vld [vmem:[%s4507_s22 + $0x38] sm:$0xff]  ;;  %p3981_p1 = pnand %p3980_p12, %p3974_p8 }
 0x156   : > { %3217 = vmatpush3.bf16.msra.mxu0 %v3216_v31  ;;  %v831_v21 = vld [vmem:[#allocation17 + $0x48] sm:$0xff]  ;;  %v917_v22 = vld [vmem:[#allocation18 + $0x40] sm:$0xff]  ;;  %v832_v26 = vld [vmem:[#allocation17 + $0x50] sm:$0xff] }
 0x157   : > { %3218 = vmatprep.subr.bf16.mxu0 %v5486_v0  ;;  %v918_v23 = vld [vmem:[#allocation18 + $0x48] sm:$0xff]  ;;  %v3272_v25 = vpack.c.bf16 %v831_v21, %v830_v18  ;;  %v4585_v27 = vld [vmem:[%s4507_s22 + $0x40] sm:$0xff]  ;;  %v919_v31 = vld [vmem:[#allocation18 + $0x50] sm:$0xff] }
 0x158   : > { %3246 = vmatpush3.bf16.msra.mxu1 %v3243_v33  ;;  %v3299_v28 = vpack.c.bf16 %v918_v23, %v917_v22  ;;  %v833_v29 = vld [vmem:[#allocation17 + $0x58] sm:$0xff]  ;;  %v537_v33 = vld [vmem:[%s4507_s22 + $0x48] sm:$0xff]  ;;  %v538_v36 = vld [vmem:[%s4507_s22 + $0x50] sm:$0xff] }
 0x159   : > { %3248 = vmatprep.subr.bf16.mxu1 %v3247_v39  ;;  %v920_v32 = vld [vmem:[#allocation18 + $0x58] sm:$0xff]  ;;  %v3275_v34 = vpack.c.bf16 %v833_v29, %v832_v26  ;;  %v834_v35 = vld [vmem:[#allocation17 + $0x60] sm:$0xff]  ;;  %v835_v38 = vld [vmem:[#allocation17 + $0x68] sm:$0xff]  ;;  %v5480_v29 = vmov 3  }
 0x15a   : > { %3220 = vmatpush3.bf16.msra.mxu0 %v3219_v37  ;;  %v3303_v37 = vpack.c.bf16 %v920_v32, %v919_v31  ;;  %v922_v40 = vld [vmem:[#allocation18 + $0x68] sm:$0xff]  ;;  %v539_v41 = vld [vmem:[%s4507_s22 + $0x58] sm:$0xff]  ;;  %v3278_v42 = vpack.c.bf16 %v835_v38, %v834_v35  ;;  %v540_v44 = vld [vmem:[%s4507_s22 + $0x60] sm:$0xff]  ;;  %v5488_v35 = vmov 6   ;;  %v5478_v38 = vmov 5  }
 0x15b   : > { %3221 = vmatprep.subr.bf16.mxu0 %v5486_v0  ;;  %v837_v46 = vld [vmem:[#allocation17 + $0x78] sm:$0xff]  ;;  %v923_v47 = vld [vmem:[#allocation18 + $0x70] sm:$0xff] }
 0x15c   : > { %3250 = vmatpush3.bf16.msra.mxu1 %v3247_v39  ;;  %v921_v39 = vld [vmem:[#allocation18 + $0x60] sm:$0xff]  ;;  %v924_v48 = vld [vmem:[#allocation18 + $0x78] sm:$0xff] }
 0x15d   : > { %3252 = vmatprep.subr.bf16.mxu1 %v3251_v45  ;;  %v3311_v52 = vpack.c.bf16 %v924_v48, %v923_v47  ;;  %v543_v53 = vld [vmem:[%s4507_s22 + $0x78] sm:$0xff]  ;;  %v4628_v61 = vld [vmem:[#allocation15] ss:$0 sm:$0xff] }
 0x15e   : > { %3223 = vmatpush3.bf16.msra.mxu0 %v3222_v43  ;;  %v836_v43 = vld [vmem:[#allocation17 + $0x70] sm:$0xff] }
 0x15f   : > { %3224 = vmatprep.subr.bf16.mxu0 %v5486_v0  ;;  %v3281_v50 = vpack.c.bf16 %v837_v46, %v836_v43  ;;  %v5472_v43 = vmov 7  }
 0x160   : > { %3254 = vmatpush3.bf16.msra.mxu1 %v3251_v45  ;;  %v3307_v45 = vpack.c.bf16 %v922_v40, %v921_v39 }
 0x161   : > { %3256 = vmatprep.subr.bf16.mxu1 %v3255_v51 }
 0x162   : > { %3226 = vmatpush3.bf16.msra.mxu0 %v3225_v49  ;;  %v541_v49 = vld [vmem:[%s4507_s22 + $0x68] sm:$0xff] }
 0x163   : > { %3259 = vmatprep.subr.bf16.mxu0 %v5486_v0 }
 0x164   : > { %3258 = vmatpush3.bf16.msra.mxu1 %v3255_v51  ;;  %v542_v51 = vld [vmem:[%s4507_s22 + $0x70] sm:$0xff] }
 0x165   : > { %2914 = vmatmul.mubr.f32.vlgmr.msra.gmra.mrb[0].mxu0 %v4548_v55  ;;  %3284 = vmatprep.subr.bf16.mxu1 %v3283_v58 }
 0x166   : > { %3261 = vmatpush3.bf16.msra.mxu0 %v3260_v56  ;;  %3004 = vmatprep.mubr.msk.f32.mxu0 %vm4078_vm0, %v5470_v1 }
 0x167   : > { %3262 = vmatprep.subr.bf16.mxu0 %v5486_v0  ;;  %2949 = vmatmul.mubr.f32.vlgmr.msra.gmra.mrb[0].mxu1 %v4553_v62 }
 0x168   : > { %3286 = vmatpush3.bf16.msra.mxu1 %v3283_v58  ;;  %2951 = vmatprep.mubr.f32.mxu1 %v4556_v3 }
 0x169   : > { %3288 = vmatprep.subr.bf16.mxu1 %v3287_v4 }
 0x16a   : > { %3264 = vmatpush3.bf16.msra.mxu0 %v3263_v63 }
 0x16b   : > { %3265 = vmatprep.subr.bf16.mxu0 %v5486_v0  ;;  %2952 = vmatmul.mubr.f32.gmra.mrb[2].mxu1 %v4564_v8 }
 0x16c   : > { %3290 = vmatpush3.bf16.msra.mxu1 %v3287_v4  ;;  %2954 = vmatprep.mubr.f32.mxu1 %v4567_v11 }
 0x16d   : > { %3292 = vmatprep.subr.bf16.mxu1 %v3291_v12 }
 0x16e   : > { %3267 = vmatpush3.bf16.msra.mxu0 %v3266_v9 }
 0x16f   : > { %3268 = vmatprep.subr.bf16.mxu0 %v5486_v0  ;;  %2955 = vmatmul.mubr.f32.gmra.mrb[4].mxu1 %v4573_v16 }
 0x170   : > { %3294 = vmatpush3.bf16.msra.mxu1 %v3291_v12  ;;  %2957 = vmatprep.mubr.f32.mxu1 %v4576_v19 }
 0x171   : > { %3296 = vmatprep.subr.bf16.mxu1 %v3295_v20 }
 0x172   : > { %3270 = vmatpush3.bf16.msra.mxu0 %v3269_v17 }
 0x173   : > { %3271 = vmatprep.subr.bf16.mxu0 %v5486_v0  ;;  %2958 = vmatmul.mubr.f32.gmra.mrb[6].mxu1 %v4582_v24 }
 0x174   : > { %3298 = vmatpush3.bf16.msra.mxu1 %v3295_v20  ;;  %2960 = vmatprep.mubr.f32.mxu1 %v4585_v27 }
 0x175   : > { %3300 = vmatprep.subr.bf16.mxu1 %v3299_v28 }
 0x176   : > { %3273 = vmatpush3.bf16.msra.mxu0 %v3272_v25 }
 0x177   : > { %3274 = vmatprep.subr.bf16.mxu0 %v5486_v0  ;;  %2961 = vmatmul.mubr.f32.gmra.mrb[8].mxu1 %v537_v33 }
 0x178   : > { %3302 = vmatpush3.bf16.msra.mxu1 %v3299_v28  ;;  %2963 = vmatprep.mubr.f32.mxu1 %v538_v36  ;;  %v5476_v28 = vmov 2  }
 0x179   : > { %3304 = vmatprep.subr.bf16.mxu1 %v3303_v37 }
 0x17a   : > { %3276 = vmatpush3.bf16.msra.mxu0 %v3275_v34 }
 0x17b   : > { %3277 = vmatprep.subr.bf16.mxu0 %v5486_v0  ;;  %2964 = vmatmul.mubr.f32.gmra.mrb[10].mxu1 %v539_v41 }
 0x17c   : > { %3306 = vmatpush3.bf16.msra.mxu1 %v3303_v37  ;;  %2966 = vmatprep.mubr.f32.mxu1 %v540_v44 }
 0x17d   : > { %3308 = vmatprep.subr.bf16.mxu1 %v3307_v45 }
 0x17e   : > { %3279 = vmatpush3.bf16.msra.mxu0 %v3278_v42  ;;  %v5474_v42 = vmov 4  }
 0x17f   : > { %3280 = vmatprep.subr.bf16.mxu0 %v5486_v0  ;;  %2967 = vmatmul.mubr.f32.gmra.mrb[12].mxu1 %v541_v49 }
 0x180   : > { %3310 = vmatpush3.bf16.msra.mxu1 %v3307_v45  ;;  %2969 = vmatprep.mubr.f32.mxu1 %v542_v51 }
 0x181   : > { %3312 = vmatprep.subr.bf16.mxu1 %v3311_v52 }
 0x182   : > { %3282 = vmatpush3.bf16.msra.mxu0 %v3281_v50 }
 0x183   : > { %3315 = vmatprep.subr.bf16.mxu0 %v5486_v0  ;;  %2970 = vmatmul.mubr.f32.gmra.mrb[14].mxu1 %v543_v53 }
 0x184   : > { %3314 = vmatpush3.bf16.msra.mxu1 %v3311_v52  ;;  %3039 = vmatprep.mubr.f32.mxu1 %v4540_v30  ;;  %v5482_v30 = vmov 1  }
 0x185   : > { %3005 = vmatmul.mubr.f32.vlgmr.msra.gmra.mrb[2].mxu0 %v4548_v55  ;;  %3339 = vmatprep.subr.bf16.mxu1 %v5486_v0 }
 0x186   : > { %3095 = vmatprep.mubr.msk.f32.mxu0 %vm4078_vm0, %v5470_v1  ;;  %3561 = vset.pattern.permute.xlu1 %v5482_v30 }
 0x187   : > { %3040 = vmatmul.mubr.f32.vlgmr.msra.gmra.mrb[16].mxu1 %v4553_v62 }
 0x188   : > { %3042 = vmatprep.mubr.f32.mxu1 %v4556_v3 }
 0x18b   : > { %3043 = vmatmul.mubr.f32.gmra.mrb[18].mxu1 %v4564_v8 }
 0x18c   : > { %3045 = vmatprep.mubr.f32.mxu1 %v4567_v11 }
 0x18f   : > { %3046 = vmatmul.mubr.f32.gmra.mrb[20].mxu1 %v4573_v16 }
 0x190   : > { %3048 = vmatprep.mubr.f32.mxu1 %v4576_v19 }
 0x193   : > { %3049 = vmatmul.mubr.f32.gmra.mrb[22].mxu1 %v4582_v24 }
 0x194   : > { %3051 = vmatprep.mubr.f32.mxu1 %v4585_v27 }
 0x197   : > { %3052 = vmatmul.mubr.f32.gmra.mrb[24].mxu1 %v537_v33 }
 0x198   : > { %3054 = vmatprep.mubr.f32.mxu1 %v538_v36 }
 0x19b   : > { %3055 = vmatmul.mubr.f32.gmra.mrb[26].mxu1 %v539_v41 }
 0x19c   : > { %3057 = vmatprep.mubr.f32.mxu1 %v540_v44 }
 0x19f   : > { %3058 = vmatmul.mubr.f32.gmra.mrb[28].mxu1 %v541_v49 }
 0x1a0   : > { %3060 = vmatprep.mubr.f32.mxu1 %v542_v51 }
 0x1a3   : > { %3061 = vmatmul.mubr.f32.gmra.mrb[30].mxu1 %v543_v53 }
 0x1a4   : > { %3130 = vmatprep.mubr.msk.f32.mxu1 %vm4078_vm0, %v5470_v1 }
 0x238   : > { %v4618_v55 = vpop.f32.mrb[0].mxu0 }
 0x239   : > { %5540 = vst [vmem:[#allocation33_spill] sm:$0xff] %v4618_v55  ;;  %v2915_v56 = vpop.f32.mrb[1].mxu0 }
 0x23a   : > { %v4620_v57 = vpop.f32.mrb[0].mxu1 }
 0x23b   : > { %v4622_v58 = vpop.f32.mrb[1].mxu1 }
 0x23e   : > { %v4624_v59 = vpop.f32.mrb[2].mxu1 }
 0x23f   : > { %v4626_v60 = vpop.f32.mrb[3].mxu1 }
 0x242   : > { %v2956_v62 = vpop.f32.mrb[4].mxu1 }
 0x243   : > { %v4631_v63 = vadd.f32 %v2956_v62, %v4628_v61  ;;  %v747_v2 = vpop.f32.mrb[5].mxu1  ;;  %v4800_v62 = vld [vmem:[#allocation21 + $0x6] ss:$0 sm:$0xff] }
 0x244   : > { %v4634_v3 = vadd.f32 %v4628_v61, %v747_v2 }
 0x246   : > { %v2959_v4 = vpop.f32.mrb[6].mxu1 }
 0x247   : > { %v4637_v5 = vadd.f32 %v2959_v4, %v4628_v61  ;;  %v757_v6 = vpop.f32.mrb[7].mxu1  ;;  %v733_v4 = vadd.f32 %v4620_v57, %v4628_v61  ;;  %v4815_v57 = vld [vmem:[#allocation21] ss:$0 sm:$0xff] }
 0x248   : > { %v4640_v7 = vadd.f32 %v4628_v61, %v757_v6 }
 0x24a   : > { %v2962_v8 = vpop.f32.mrb[8].mxu1 }
 0x24b   : > { %v4643_v9 = vadd.f32 %v2962_v8, %v4628_v61  ;;  %v767_v10 = vpop.f32.mrb[9].mxu1 }
 0x24c   : > { %v4646_v11 = vadd.f32 %v4628_v61, %v767_v10 }
 0x24e   : > { %v2965_v12 = vpop.f32.mrb[10].mxu1 }
 0x24f   : > { %v4649_v13 = vadd.f32 %v2965_v12, %v4628_v61  ;;  %v777_v14 = vpop.f32.mrb[11].mxu1 }
 0x250   : > { %v4652_v15 = vadd.f32 %v4628_v61, %v777_v14 }
 0x252   : > { %v2968_v16 = vpop.f32.mrb[12].mxu1 }
 0x253   : > { %v4655_v17 = vadd.f32 %v2968_v16, %v4628_v61  ;;  %v787_v18 = vpop.f32.mrb[13].mxu1  ;;  %v4818_v16 = vld [vmem:[#allocation21 + $0x4] ss:$0 sm:$0xff] }
 0x254   : > { %v4658_v19 = vadd.f32 %v4628_v61, %v787_v18 }
 0x255   : > { %5541 = vst [vmem:[#allocation34_spill] sm:$0xff] %v4655_v17 }
 0x256   : > { %5542 = vst [vmem:[#allocation35_spill] sm:$0xff] %v4658_v19  ;;  %v2971_v20 = vpop.f32.mrb[14].mxu1 }
 0x257   : > { %v4663_v22 = vadd.f32 %v2971_v20, %v4628_v61  ;;  %v797_v23 = vpop.f32.mrb[15].mxu1  ;;  %v4820_v20 = vld [vmem:[#allocation21 + $0x1] ss:$0 sm:$0xff] }
 0x258   : > { %v4660_v21 = vpop.f32.mrb[2].mxu0  ;;  %v4668_v25 = vadd.f32 %v4628_v61, %v797_v23  ;;  %v4822_v23 = vld [vmem:[#allocation21 + $0x5] ss:$0 sm:$0xff] }
 0x259   : > { %5543 = vst [vmem:[#allocation36_spill] sm:$0xff] %v4663_v22  ;;  %1251 = vperm.xlu1 %3561, %v4660_v21   ;;  %1107 = vperm.xlu0 %3560, %v4660_v21   ;;  %v3006_v24 = vpop.f32.mrb[3].mxu0 }
 0x25a   : > { %5544 = vst [vmem:[#allocation37_spill] sm:$0xff] %v4668_v25  ;;  %v3041_v26 = vpop.f32.mrb[16].mxu1 }
 0x25b   : > { %v991_v27 = vpop.f32.mrb[17].mxu1 }
 0x25d   : > { %3562 = vset.pattern.permute.xlu1 %v5476_v28  ;;  %3563 = vset.pattern.permute.xlu0 %v5480_v29 }
 0x25e   : > { %1454 = vperm.xlu1 %3562, %v4660_v21   ;;  %1599 = vperm.xlu0 %3563, %v4660_v21   ;;  %v4674_v31 = vpop.f32.mrb[18].mxu1 }
 0x25f   : > { %v4676_v32 = vpop.f32.mrb[19].mxu1 }
 0x262   : > { %3564 = vset.pattern.permute.xlu1 %v5484_v54  ;;  %1614 = vperm.xlu0 %3563, %v3041_v26   ;;  %v4679_v33 = vpop.f32.mrb[20].mxu1 }
 0x263   : > { %1140 = vperm.xlu1 %3564, %v3041_v26   ;;  %v4681_v34 = vpop.f32.mrb[21].mxu1 }
 0x266   : > { %3568 = vset.pattern.permute.xlu0 %v5488_v35  ;;  %v4685_v36 = vpop.f32.mrb[22].mxu1 }
 0x267   : > { %3565 = vset.pattern.permute.xlu1 %v5482_v30  ;;  %2184 = vperm.xlu0 %3568, %v3041_v26   ;;  %v4687_v37 = vpop.f32.mrb[23].mxu1 }
 0x268   : > { %1266 = vperm.xlu1 %3565, %v3041_v26  }
 0x26a   : > { %v4690_v39 = vpop.f32.mrb[24].mxu1 }
 0x26b   : > { %3569 = vset.pattern.permute.xlu0 %v5478_v38  ;;  %v4693_v40 = vpop.f32.mrb[25].mxu1 }
 0x26c   : > { %3566 = vset.pattern.permute.xlu1 %v5476_v28  ;;  %1962 = vperm.xlu0 %3569, %v3041_v26  }
 0x26d   : > { %1488 = vperm.xlu1 %3566, %v3041_v26  }
 0x26e   : > { %v4695_v41 = vpop.f32.mrb[26].mxu1 }
 0x26f   : > { %v4701_v44 = vpop.f32.mrb[27].mxu1 }
 0x270   : > { %3571 = vset.pattern.permute.xlu0 %v5484_v54 }
 0x271   : > { %3567 = vset.pattern.permute.xlu1 %v5474_v42  ;;  %1135 = vperm.xlu0 %3571, %v991_v27  }
 0x272   : > { %1836 = vperm.xlu1 %3567, %v3041_v26   ;;  %v4705_v45 = vpop.f32.mrb[28].mxu1 }
 0x273   : > { %v4715_v46 = vpop.f32.mrb[29].mxu1 }
 0x275   : > { %3572 = vset.pattern.permute.xlu0 %v5482_v30 }
 0x276   : > { %3570 = vset.pattern.permute.xlu1 %v5472_v43  ;;  %1262 = vperm.xlu0 %3572, %v991_v27   ;;  %v4721_v47 = vpop.f32.mrb[30].mxu1 }
 0x277   : > { %2310 = vperm.xlu1 %3570, %v3041_v26   ;;  %v4759_v48 = vpop.f32.mrb[31].mxu1 }
 0x27a   : > { %3573 = vset.pattern.permute.xlu0 %v5476_v28 }
 0x27b   : > { %3574 = vset.pattern.permute.xlu1 %v5480_v29  ;;  %1483 = vperm.xlu0 %3573, %v991_v27  }
 0x27c   : > { %1610 = vperm.xlu1 %3574, %v991_v27  }
 0x27f   : > { %3575 = vset.pattern.permute.xlu0 %v5474_v42 }
 0x280   : > { %3576 = vset.pattern.permute.xlu1 %v5488_v35  ;;  %1831 = vperm.xlu0 %3575, %v991_v27  }
 0x281   : > { %2179 = vperm.xlu1 %3576, %v991_v27  }
 0x284   : > { %3579 = vset.pattern.permute.xlu0 %v5484_v54 }
 0x285   : > { %3577 = vset.pattern.permute.xlu1 %v5478_v38  ;;  %1150 = vperm.xlu0 %3579, %v4674_v31  }
 0x286   : > { %1958 = vperm.xlu1 %3577, %v991_v27  }
 0x289   : > { %3580 = vset.pattern.permute.xlu0 %v5482_v30 }
 0x28a   : > { %3578 = vset.pattern.permute.xlu1 %v5472_v43  ;;  %1274 = vperm.xlu0 %3580, %v4674_v31  }
 0x28b   : > { %2306 = vperm.xlu1 %3578, %v991_v27  }
 0x28e   : > { %3585 = vset.pattern.permute.xlu0 %v5478_v38 }
 0x28f   : > { %3581 = vset.pattern.permute.xlu1 %v5476_v28  ;;  %1970 = vperm.xlu0 %3585, %v4674_v31  }
 0x290   : > { %1498 = vperm.xlu1 %3581, %v4674_v31  }
 0x293   : > { %3590 = vset.pattern.permute.xlu0 %v5480_v29 }
 0x294   : > { %3582 = vset.pattern.permute.xlu1 %v5480_v29  ;;  %1618 = vperm.xlu0 %3590, %v4676_v32  }
 0x295   : > { %1622 = vperm.xlu1 %3582, %v4674_v31  }
 0x298   : > { %3592 = vset.pattern.permute.xlu0 %v5488_v35 }
 0x299   : > { %3583 = vset.pattern.permute.xlu1 %v5474_v42  ;;  %2189 = vperm.xlu0 %3592, %v4676_v32  }
 0x29a   : > { %1846 = vperm.xlu1 %3583, %v4674_v31  }
 0x29d   : > { %3595 = vset.pattern.permute.xlu0 %v5484_v54 }
 0x29e   : > { %3584 = vset.pattern.permute.xlu1 %v5488_v35  ;;  %1160 = vperm.xlu0 %3595, %v4679_v33  }
 0x29f   : > { %2194 = vperm.xlu1 %3584, %v4674_v31  }
 0x2a2   : > { %3596 = vset.pattern.permute.xlu0 %v5482_v30 }
 0x2a3   : > { %3586 = vset.pattern.permute.xlu1 %v5472_v43  ;;  %1282 = vperm.xlu0 %3596, %v4679_v33  }
 0x2a4   : > { %2318 = vperm.xlu1 %3586, %v4674_v31  }
 0x2a7   : > { %3598 = vset.pattern.permute.xlu0 %v5480_v29 }
 0x2a8   : > { %3587 = vset.pattern.permute.xlu1 %v5484_v54  ;;  %1630 = vperm.xlu0 %3598, %v4679_v33  }
 0x2a9   : > { %1145 = vperm.xlu1 %3587, %v4676_v32  }
 0x2ac   : > { %3600 = vset.pattern.permute.xlu0 %v5488_v35 }
 0x2ad   : > { %3588 = vset.pattern.permute.xlu1 %v5482_v30  ;;  %2204 = vperm.xlu0 %3600, %v4679_v33  }
 0x2ae   : > { %1270 = vperm.xlu1 %3588, %v4676_v32  }
 0x2b1   : > { %3605 = vset.pattern.permute.xlu0 %v5476_v28 }
 0x2b2   : > { %3589 = vset.pattern.permute.xlu1 %v5476_v28  ;;  %1503 = vperm.xlu0 %3605, %v4681_v34  }
 0x2b3   : > { %1493 = vperm.xlu1 %3589, %v4676_v32  }
 0x2b6   : > { %3607 = vset.pattern.permute.xlu0 %v5474_v42 }
 0x2b7   : > { %3591 = vset.pattern.permute.xlu1 %v5474_v42  ;;  %1851 = vperm.xlu0 %3607, %v4681_v34  }
 0x2b8   : > { %1841 = vperm.xlu1 %3591, %v4676_v32  }
 0x2bb   : > { %3610 = vset.pattern.permute.xlu0 %v5484_v54 }
 0x2bc   : > { %3593 = vset.pattern.permute.xlu1 %v5478_v38  ;;  %1170 = vperm.xlu0 %3610, %v4685_v36  }
 0x2bd   : > { %1966 = vperm.xlu1 %3593, %v4676_v32  }
 0x2c0   : > { %3611 = vset.pattern.permute.xlu0 %v5482_v30 }
 0x2c1   : > { %3594 = vset.pattern.permute.xlu1 %v5472_v43  ;;  %1290 = vperm.xlu0 %3611, %v4685_v36  }
 0x2c2   : > { %2314 = vperm.xlu1 %3594, %v4676_v32   ;;  %v728_v32 = vadd.f32 %v4628_v61, %v4622_v58 }
 0x2c5   : > { %3614 = vset.pattern.permute.xlu0 %v5474_v42 }
 0x2c6   : > { %3597 = vset.pattern.permute.xlu1 %v5476_v28  ;;  %1866 = vperm.xlu0 %3614, %v4685_v36  }
 0x2c7   : > { %1508 = vperm.xlu1 %3597, %v4679_v33  }
 0x2ca   : > { %3620 = vset.pattern.permute.xlu0 %v5480_v29 }
 0x2cb   : > { %3599 = vset.pattern.permute.xlu1 %v5474_v42  ;;  %1634 = vperm.xlu0 %3620, %v4687_v37  }
 0x2cc   : > { %1856 = vperm.xlu1 %3599, %v4679_v33  }
 0x2cf   : > { %3623 = vset.pattern.permute.xlu0 %v5478_v38 }
 0x2d0   : > { %3601 = vset.pattern.permute.xlu1 %v5478_v38  ;;  %1982 = vperm.xlu0 %3623, %v4687_v37  }
 0x2d1   : > { %1978 = vperm.xlu1 %3601, %v4679_v33  }
 0x2d4   : > { %3625 = vset.pattern.permute.xlu0 %v5484_v54 }
 0x2d5   : > { %3602 = vset.pattern.permute.xlu1 %v5472_v43  ;;  %1180 = vperm.xlu0 %3625, %v4690_v39  }
 0x2d6   : > { %2326 = vperm.xlu1 %3602, %v4679_v33  }
 0x2d8   : > { %v4781_v49 = vpop.permute.xlu1 %1251  ;;  %v4783_v50 = vpop.permute.xlu0 %1107 }
 0x2d9   : > { %5545 = vst [vmem:[#allocation38_spill] sm:$0xff] %v4781_v49  ;;  %5546 = vst [vmem:[#allocation39_spill] sm:$0xff] %v4783_v50  ;;  %3626 = vset.pattern.permute.xlu0 %v5482_v30 }
 0x2da   : > { %3603 = vset.pattern.permute.xlu1 %v5484_v54  ;;  %1298 = vperm.xlu0 %3626, %v4690_v39  }
 0x2db   : > { %1155 = vperm.xlu1 %3603, %v4681_v34  }
 0x2dd   : > { %v4789_v51 = vpop.permute.xlu1 %1454  ;;  %v4791_v52 = vpop.permute.xlu0 %1599 }
 0x2de   : > { %5547 = vst [vmem:[#allocation40_spill] sm:$0xff] %v4789_v51  ;;  %5548 = vst [vmem:[#allocation41_spill] sm:$0xff] %v4791_v52  ;;  %3628 = vset.pattern.permute.xlu0 %v5480_v29 }
 0x2df   : > { %3604 = vset.pattern.permute.xlu1 %v5482_v30  ;;  %1646 = vperm.xlu0 %3628, %v4690_v39  }
 0x2e0   : > { %1278 = vperm.xlu1 %3604, %v4681_v34  }
 0x2e1   : > { %v1615_v53 = vpop.permute.xlu0 %1614 }
 0x2e2   : > { %v1141_v56 = vpop.permute.xlu1 %1140 }
 0x2e3   : > { %3631 = vset.pattern.permute.xlu0 %v5478_v38  ;;  %v1218_v26 = vmul.f32 %v4815_v57, %v1141_v56 }
 0x2e4   : > { %3606 = vset.pattern.permute.xlu1 %v5480_v29  ;;  %1994 = vperm.xlu0 %3631, %v4690_v39  }
 0x2e5   : > { %1626 = vperm.xlu1 %3606, %v4681_v34  }
 0x2e6   : > { %v2185_v2 = vpop.permute.xlu0 %2184 }
 0x2e7   : > { %v2262_v6 = vmul.f32 %v4800_v62, %v2185_v2  ;;  %v1267_v8 = vpop.permute.xlu1 %1266 }
 0x2e8   : > { %3635 = vset.pattern.permute.xlu0 %v5476_v28  ;;  %v1330_v33 = vmul.f32 %v4820_v20, %v1267_v8 }
 0x2e9   : > { %v4807_v10 = vadd.f32 %v2262_v6, %v733_v4  ;;  %3608 = vset.pattern.permute.xlu1 %v5488_v35  ;;  %1523 = vperm.xlu0 %3635, %v4693_v40   ;;  %v4834_v6 = vld [vmem:[#allocation21 + $0x2] ss:$0 sm:$0xff] }
 0x2ea   : > { %2199 = vperm.xlu1 %3608, %v4681_v34  }
 0x2eb   : > { %v1963_v12 = vpop.permute.xlu0 %1962 }
 0x2ec   : > { %v1489_v14 = vpop.permute.xlu1 %1488  ;;  %v2026_v2 = vmul.f32 %v4822_v23, %v1963_v12  ;;  %v4845_v12 = vld [vmem:[#allocation21 + $0x3] ss:$0 sm:$0xff] }
 0x2ed   : > { %3640 = vset.pattern.permute.xlu0 %v5484_v54 }
 0x2ee   : > { %3609 = vset.pattern.permute.xlu1 %v5478_v38  ;;  %1190 = vperm.xlu0 %3640, %v4695_v41   ;;  %v1566_v38 = vmul.f32 %v4834_v6, %v1489_v14 }
 0x2ef   : > { %1974 = vperm.xlu1 %3609, %v4681_v34  }
 0x2f0   : > { %v1136_v18 = vpop.permute.xlu0 %1135 }
 0x2f1   : > { %v1837_v24 = vpop.permute.xlu1 %1836  ;;  %v1217_v27 = vmul.f32 %v4815_v57, %v1136_v18 }
 0x2f2   : > { %v1914_v31 = vmul.f32 %v4818_v16, %v1837_v24  ;;  %3641 = vset.pattern.permute.xlu0 %v5482_v30  ;;  %v1234_v24 = vadd.f32 %v1218_v26, %v733_v4 }
 0x2f3   : > { %3612 = vset.pattern.permute.xlu1 %v5476_v28  ;;  %1306 = vperm.xlu0 %3641, %v4695_v41   ;;  %v1233_v1 = vadd.f32 %v1217_v27, %v728_v32 }
 0x2f4   : > { %v1930_v56 = vadd.f32 %v1914_v31, %v733_v4  ;;  %1518 = vperm.xlu1 %3612, %v4685_v36   ;;  %v1346_v58 = vadd.f32 %v1330_v33, %v1234_v24  ;;  %v1582_v31 = vadd.f32 %v1566_v38, %v733_v4 }
 0x2f5   : > { %v1263_v18 = vpop.permute.xlu0 %1262 }
 0x2f6   : > { %v4837_v43 = vadd.f32 %v2026_v2, %v1930_v56  ;;  %v1329_v42 = vmul.f32 %v4820_v20, %v1263_v18  ;;  %v2311_v28 = vpop.permute.xlu1 %2310 }
 0x2f7   : > { %3647 = vset.pattern.permute.xlu0 %v5480_v29 }
 0x2f8   : > { %5549 = vst [vmem:[#allocation42_spill] sm:$0xff] %v4837_v43  ;;  %v1345_v8 = vadd.f32 %v1329_v42, %v1233_v1  ;;  %3613 = vset.pattern.permute.xlu1 %v5480_v29  ;;  %1650 = vperm.xlu0 %3647, %v4701_v44   ;;  %v1678_v1 = vmul.f32 %v4845_v12, %v1615_v53  ;;  %v5550_v53 = vmov 5  }
 0x2f9   : > { %1638 = vperm.xlu1 %3613, %v4685_v36  }
 0x2fa   : > { %v3316_v26 = vpack.c.bf16 %v1346_v58, %v1345_v8  ;;  %v1484_v27 = vpop.permute.xlu0 %1483  ;;  %v1694_v38 = vadd.f32 %v1678_v1, %v1582_v31  ;;  %v4863_v31 = vld [vmem:[#allocation21 + $0x7] ss:$0 sm:$0xff] }
 0x2fb   : > { %v1565_v2 = vmul.f32 %v4834_v6, %v1484_v27  ;;  %v1611_v56 = vpop.permute.xlu1 %1610  ;;  %v2374_v1 = vmul.f32 %v4863_v31, %v2311_v28 }
 0x2fc   : > { %v1677_v14 = vmul.f32 %v4845_v12, %v1611_v56  ;;  %3648 = vset.pattern.permute.xlu0 %v5484_v54  ;;  %3317 = vmatpush3.bf16.xpose.msra.mxu0 %v3316_v26 }
 0x2fd   : > { %v1581_v42 = vadd.f32 %v1565_v2, %v728_v32  ;;  %3615 = vset.pattern.permute.xlu1 %v5488_v35  ;;  %1200 = vperm.xlu0 %3648, %v4705_v45  }
 0x2fe   : > { %2214 = vperm.xlu1 %3615, %v4685_v36   ;;  %3318 = vmatprep.subr.bf16.mxu0 %v5486_v0 }
 0x2ff   : > { %v1693_v4 = vadd.f32 %v1677_v14, %v1581_v42  ;;  %v1832_v33 = vpop.permute.xlu0 %1831 }
 0x300   : > { %v1913_v18 = vmul.f32 %v4818_v16, %v1832_v33  ;;  %v2180_v24 = vpop.permute.xlu1 %2179 }
 0x301   : > { %v3340_v58 = vpack.c.bf16 %v1694_v38, %v1693_v4  ;;  %3649 = vset.pattern.permute.xlu0 %v5482_v30  ;;  %v2261_v56 = vmul.f32 %v4800_v62, %v2180_v24  ;;  %v4881_v24 = vadd.f32 %v2374_v1, %v4807_v10 }
 0x302   : > { %v1929_v8 = vadd.f32 %v1913_v18, %v728_v32  ;;  %3616 = vset.pattern.permute.xlu1 %v5550_v53  ;;  %1314 = vperm.xlu0 %3649, %v4705_v45  }
 0x303   : > { %1986 = vperm.xlu1 %3616, %v4685_v36   ;;  %3341 = vmatpush3.bf16.xpose.msra.mxu1 %v3340_v58  ;;  %v2277_v33 = vadd.f32 %v2261_v56, %v728_v32  ;;  %v5552_v58 = vmov 2   ;;  %5553 = vst [vmem:[#allocation44_spill] sm:$0xff] %v4881_v24  ;;  %v5555_v56 = vmov 4   ;;  %v5558_v24 = vmov 6  }
 0x304   : > { %v4860_v26 = vpop.permute.xlu0 %1150  ;;  %3342 = vmatprep.subr.bf16.mxu1 %v5486_v0 }
 0x305   : > { %v1959_v27 = vpop.permute.xlu1 %1958 }
 0x306   : > { %v2025_v2 = vmul.f32 %v4822_v23, %v1959_v27  ;;  %3650 = vset.pattern.permute.xlu0 %v5480_v29  ;;  %v4903_v27 = vadd.f32 %v4624_v59, %v4628_v61 }
 0x307   : > { %3617 = vset.pattern.permute.xlu1 %v5484_v54  ;;  %1662 = vperm.xlu0 %3650, %v4705_v45  }
 0x308   : > { %v4870_v14 = vadd.f32 %v2025_v2, %v1929_v8  ;;  %1165 = vperm.xlu1 %3617, %v4687_v37  }
 0x309   : > { %v1275_v38 = vpop.permute.xlu0 %1274 }
 0x30a   : > { %5551 = vst [vmem:[#allocation43_spill] sm:$0xff] %v4870_v14  ;;  %v2307_v4 = vpop.permute.xlu1 %2306 }
 0x30b   : > { %v2373_v18 = vmul.f32 %v4863_v31, %v2307_v4  ;;  %3653 = vset.pattern.permute.xlu0 %v5552_v58  ;;  %v4898_v4 = vadd.f32 %v4628_v61, %v4626_v60 }
 0x30c   : > { %3618 = vset.pattern.permute.xlu1 %v5482_v30  ;;  %1543 = vperm.xlu0 %3653, %v4715_v46  }
 0x30d   : > { %v4883_v8 = vadd.f32 %v2373_v18, %v2277_v33  ;;  %1286 = vperm.xlu1 %3618, %v4687_v37  }
 0x30e   : > { %v1971_v28 = vpop.permute.xlu0 %1970 }
 0x30f   : > { %5554 = vst [vmem:[#allocation45_spill] sm:$0xff] %v4883_v8  ;;  %v1499_v32 = vpop.permute.xlu1 %1498  ;;  %v2028_v60 = vmul.f32 %v4822_v23, %v1971_v28 }
 0x310   : > { %3655 = vset.pattern.permute.xlu0 %v5484_v54 }
 0x311   : > { %3619 = vset.pattern.permute.xlu1 %v5552_v58  ;;  %1210 = vperm.xlu0 %3655, %v4721_v47  }
 0x312   : > { %1513 = vperm.xlu1 %3619, %v4687_v37  }
 0x313   : > { %v1619_v2 = vpop.permute.xlu0 %1618 }
 0x314   : > { %v1623_v10 = vpop.permute.xlu1 %1622 }
 0x315   : > { %3657 = vset.pattern.permute.xlu0 %v5482_v30 }
 0x316   : > { %3621 = vset.pattern.permute.xlu1 %v5555_v56  ;;  %1322 = vperm.xlu0 %3657, %v4721_v47  }
 0x317   : > { %1861 = vperm.xlu1 %3621, %v4687_v37  }
 0x318   : > { %v2190_v1 = vpop.permute.xlu0 %2189 }
 0x319   : > { %v2263_v33 = vmul.f32 %v4800_v62, %v2190_v1  ;;  %v1847_v18 = vpop.permute.xlu1 %1846 }
 0x31a   : > { %v1916_v42 = vmul.f32 %v4818_v16, %v1847_v18  ;;  %3658 = vset.pattern.permute.xlu0 %v5555_v56 }
 0x31b   : > { %v4908_v29 = vadd.f32 %v2263_v33, %v4898_v4  ;;  %3622 = vset.pattern.permute.xlu1 %v5488_v35  ;;  %1881 = vperm.xlu0 %3658, %v4701_v44   ;;  %v5557_v33 = vmov 7  }
 0x31c   : > { %v1932_v1 = vadd.f32 %v1916_v42, %v4903_v27  ;;  %2209 = vperm.xlu1 %3622, %v4687_v37  }
 0x31d   : > { %v4915_v30 = vpop.permute.xlu0 %1160 }
 0x31e   : > { %v4917_v59 = vadd.f32 %v2028_v60, %v1932_v1  ;;  %v4919_v61 = vpop.permute.xlu1 %2194 }
 0x31f   : > { %1896 = vperm.xlu0 %3658, %v4705_v45  }
 0x320   : > { %5556 = vst [vmem:[#allocation46_spill] sm:$0xff] %v4917_v59  ;;  %3624 = vset.pattern.permute.xlu1 %v5557_v33 }
 0x321   : > { %2330 = vperm.xlu1 %3624, %v4687_v37   ;;  %v1220_v37 = vmul.f32 %v4815_v57, %v4860_v26 }
 0x322   : > { %v4924_v18 = vpop.permute.xlu0 %1282 }
 0x323   : > { %v4926_v54 = vpop.permute.xlu1 %2318  ;;  %3669 = vset.pattern.permute.xlu0 %v5557_v33  ;;  %v1236_v8 = vadd.f32 %v1220_v37, %v4903_v27 }
 0x324   : > { %2322 = vperm.xlu0 %3669, %v4681_v34   ;;  %v1332_v34 = vmul.f32 %v4820_v20, %v1275_v38  ;;  %v1568_v38 = vmul.f32 %v4834_v6, %v1499_v32 }
 0x325   : > { %3627 = vset.pattern.permute.xlu1 %v5552_v58 }
 0x326   : > { %1528 = vperm.xlu1 %3627, %v4690_v39   ;;  %v1348_v52 = vadd.f32 %v1332_v34, %v1236_v8  ;;  %v1679_v8 = vmul.f32 %v4845_v12, %v1619_v2 }
 0x327   : > { %v4932_v42 = vpop.permute.xlu0 %1630 }
 0x328   : > { %v1146_v28 = vpop.permute.xlu1 %1145  ;;  %2334 = vperm.xlu0 %3669, %v4685_v36  }
 0x329   : > { %v1219_v60 = vmul.f32 %v4815_v57, %v1146_v28 }
 0x32a   : > { %3629 = vset.pattern.permute.xlu1 %v5555_v56 }
 0x32b   : > { %1876 = vperm.xlu1 %3629, %v4690_v39   ;;  %v1235_v36 = vadd.f32 %v1219_v60, %v4898_v4  ;;  %v1680_v60 = vmul.f32 %v4845_v12, %v1623_v10 }
 0x32c   : > { %2346 = vperm.xlu0 %3669, %v4701_v44   ;;  %v2205_v1 = vpop.permute.xlu0 %2204 }
 0x32d   : > { %v2266_v0 = vmul.f32 %v4800_v62, %v2205_v1  ;;  %v1271_v35 = vpop.permute.xlu1 %1270 }
 0x32e   : > { %v1331_v26 = vmul.f32 %v4820_v20, %v1271_v35 }
 0x32f   : > { %v4947_v28 = vadd.f32 %v2266_v0, %v4631_v63  ;;  %3630 = vset.pattern.permute.xlu1 %v5558_v24  ;;  %v1584_v0 = vadd.f32 %v1568_v38, %v4903_v27  ;;  %v5560_v38 = vmov 0  }
 0x330   : > { %v1347_v14 = vadd.f32 %v1331_v26, %v1235_v36  ;;  %2224 = vperm.xlu1 %3630, %v4690_v39   ;;  %2358 = vperm.xlu0 %3669, %v4705_v45  }
 0x331   : > { %v4953_v1 = vpop.permute.xlu0 %1503  ;;  %v1696_v32 = vadd.f32 %v1680_v60, %v1584_v0 }
 0x332   : > { %v3319_v37 = vpack.c.bf16 %v1348_v52, %v1347_v14  ;;  %v1494_v43 = vpop.permute.xlu1 %1493  ;;  %v5559_v14 = vmov 0.0|0.0  }
 0x333   : > { %v1567_v35 = vmul.f32 %v4834_v6, %v1494_v43 }
 0x334   : > { %3632 = vset.pattern.permute.xlu1 %v5557_v33  ;;  %3673 = vset.pattern.permute.xlu0 %v5558_v24 }
 0x335   : > { %v1583_v34 = vadd.f32 %v1567_v35, %v4898_v4  ;;  %3320 = vmatpush3.bf16.xpose.msra.mxu0 %v3319_v37  ;;  %2342 = vperm.xlu1 %3632, %v4690_v39  }
 0x336   : > { %2219 = vperm.xlu0 %3673, %v4693_v40   ;;  %v1852_v52 = vpop.permute.xlu0 %1851  ;;  %3321 = vmatprep.subr.bf16.mxu0 %v5559_v14 }
 0x337   : > { %v1695_v43 = vadd.f32 %v1679_v8, %v1583_v34  ;;  %v1917_v10 = vmul.f32 %v4818_v16, %v1852_v52  ;;  %v1842_v36 = vpop.permute.xlu1 %1841  ;;  %v2264_v8 = vmul.f32 %v4800_v62, %v4919_v61  ;;  %v5561_v34 = vmov 1  }
 0x338   : > { %v1915_v2 = vmul.f32 %v4818_v16, %v1842_v36 }
 0x339   : > { %v4967_v26 = vadd.f32 %v1917_v10, %v4634_v3  ;;  %3633 = vset.pattern.permute.xlu1 %v5560_v38  ;;  %v3343_v37 = vpack.c.bf16 %v1696_v32, %v1695_v43  ;;  %v2376_v32 = vmul.f32 %v4863_v31, %v4926_v54  ;;  %v2280_v36 = vadd.f32 %v2264_v8, %v4903_v27 }
 0x33a   : > { %2234 = vperm.xlu0 %3673, %v4695_v41   ;;  %1175 = vperm.xlu1 %3633, %v4693_v40   ;;  %v1931_v35 = vadd.f32 %v1915_v2, %v4898_v4  ;;  %v5563_v2 = vmov 3   ;;  %v1222_v4 = vmul.f32 %v4815_v57, %v4915_v30 }
 0x33b   : > { %3344 = vmatpush3.bf16.xpose.msra.mxu1 %v3343_v37  ;;  %v4973_v39 = vpop.permute.xlu0 %1170  ;;  %v4996_v37 = vadd.f32 %v2376_v32, %v2280_v36 }
 0x33c   : > { %v1967_v60 = vpop.permute.xlu1 %1966  ;;  %3345 = vmatprep.subr.bf16.mxu1 %v5559_v14  ;;  %v1238_v51 = vadd.f32 %v1222_v4, %v4631_v63  ;;  %v1682_v4 = vmul.f32 %v4845_v12, %v4932_v42 }
 0x33d   : > { %v2027_v0 = vmul.f32 %v4822_v23, %v1967_v60  ;;  %5564 = vst [vmem:[#allocation48_spill] sm:$0xff] %v4996_v37 }
 0x33e   : > { %2249 = vperm.xlu0 %3673, %v4759_v48   ;;  %3634 = vset.pattern.permute.xlu1 %v5561_v34 }
 0x33f   : > { %v4982_v52 = vadd.f32 %v2027_v0, %v1931_v35  ;;  %1294 = vperm.xlu1 %3634, %v4693_v40  }
 0x340   : > { %v4987_v43 = vpop.permute.xlu0 %1290 }
 0x341   : > { %5562 = vst [vmem:[#allocation47_spill] sm:$0xff] %v4982_v52  ;;  %v2315_v10 = vpop.permute.xlu1 %2314 }
 0x342   : > { %v2375_v61 = vmul.f32 %v4863_v31, %v2315_v10  ;;  %3675 = vset.pattern.permute.xlu0 %v5550_v53 }
 0x343   : > { %2006 = vperm.xlu0 %3675, %v4715_v46   ;;  %3636 = vset.pattern.permute.xlu1 %v5563_v2 }
 0x344   : > { %v4999_v54 = vadd.f32 %v2375_v61, %v4908_v29  ;;  %1642 = vperm.xlu1 %3636, %v4693_v40  }
 0x345   : > { %v5004_v35 = vpop.permute.xlu0 %1866 }
 0x346   : > { %5565 = vst [vmem:[#allocation49_spill] sm:$0xff] %v4999_v54  ;;  %v1509_v27 = vpop.permute.xlu1 %1508 }
 0x347   : > { %2018 = vperm.xlu0 %3675, %v4721_v47   ;;  %v1570_v52 = vmul.f32 %v4834_v6, %v1509_v27 }
 0x348   : > { %3637 = vset.pattern.permute.xlu1 %v5555_v56 }
 0x349   : > { %1871 = vperm.xlu1 %3637, %v4693_v40  }
 0x34a   : > { %v5009_v0 = vpop.permute.xlu0 %1634 }
 0x34b   : > { %3679 = vset.pattern.permute.xlu0 %v5555_v56  ;;  %v1857_v29 = vpop.permute.xlu1 %1856 }
 0x34c   : > { %1802 = vperm.xlu0 %3679, %v4660_v21   ;;  %v1918_v42 = vmul.f32 %v4818_v16, %v1857_v29 }
 0x34d   : > { %3638 = vset.pattern.permute.xlu1 %v5550_v53 }
 0x34e   : > { %1990 = vperm.xlu1 %3638, %v4693_v40  }
 0x34f   : > { %v5015_v8 = vpop.permute.xlu0 %1982 }
 0x350   : > { %3682 = vset.pattern.permute.xlu0 %v5557_v33  ;;  %v1979_v32 = vpop.permute.xlu1 %1978 }
 0x351   : > { %2295 = vperm.xlu0 %3682, %v4660_v21  }
 0x352   : > { %3639 = vset.pattern.permute.xlu1 %v5557_v33 }
 0x353   : > { %2338 = vperm.xlu1 %3639, %v4693_v40   ;;  %v1334_v40 = vmul.f32 %v4820_v20, %v4924_v18  ;;  %v1586_v18 = vadd.f32 %v1570_v52, %v4631_v63 }
 0x354   : > { %v5021_v10 = vpop.permute.xlu0 %1180 }
 0x355   : > { %v5023_v36 = vpop.permute.xlu1 %2326  ;;  %v1350_v55 = vadd.f32 %v1334_v40, %v1238_v51  ;;  %v1698_v51 = vadd.f32 %v1682_v4, %v1586_v18 }
 0x357   : > { %3642 = vset.pattern.permute.xlu1 %v5552_v58 }
 0x358   : > { %1538 = vperm.xlu1 %3642, %v4695_v41  }
 0x359   : > { %v5027_v61 = vpop.permute.xlu0 %1298 }
 0x35a   : > { %v1156_v60 = vpop.permute.xlu1 %1155 }
 0x35b   : > { %v1221_v54 = vmul.f32 %v4815_v57, %v1156_v60  ;;  %v1569_v60 = vmul.f32 %v4834_v6, %v4953_v1 }
 0x35c   : > { %3643 = vset.pattern.permute.xlu1 %v5563_v2 }
 0x35d   : > { %1654 = vperm.xlu1 %3643, %v4695_v41   ;;  %v1237_v49 = vadd.f32 %v1221_v54, %v4634_v3 }
 0x35e   : > { %v5036_v37 = vpop.permute.xlu0 %1646 }
 0x35f   : > { %v1279_v59 = vpop.permute.xlu1 %1278 }
 0x360   : > { %v1333_v30 = vmul.f32 %v4820_v20, %v1279_v59  ;;  %v1585_v59 = vadd.f32 %v1569_v60, %v4634_v3 }
 0x361   : > { %3644 = vset.pattern.permute.xlu1 %v5560_v38 }
 0x362   : > { %v1349_v50 = vadd.f32 %v1333_v30, %v1237_v49  ;;  %1185 = vperm.xlu1 %3644, %v4701_v44   ;;  %v1934_v30 = vadd.f32 %v1918_v42, %v4631_v63 }
 0x363   : > { %v5047_v25 = vpop.permute.xlu0 %1994 }
 0x364   : > { %v3322_v27 = vpack.c.bf16 %v1350_v55, %v1349_v50  ;;  %v1627_v22 = vpop.permute.xlu1 %1626 }
 0x365   : > { %v1681_v54 = vmul.f32 %v4845_v12, %v1627_v22  ;;  %v2030_v22 = vmul.f32 %v4822_v23, %v1979_v32 }
 0x366   : > { %3645 = vset.pattern.permute.xlu1 %v5561_v34  ;;  %3323 = vmatpush3.bf16.xpose.msra.mxu0 %v3322_v27 }
 0x367   : > { %v1697_v49 = vadd.f32 %v1681_v54, %v1585_v59  ;;  %1302 = vperm.xlu1 %3645, %v4701_v44   ;;  %3324 = vmatprep.subr.bf16.mxu0 %v5559_v14  ;;  %v5070_v18 = vadd.f32 %v2030_v22, %v1934_v30  ;;  %v1224_v22 = vmul.f32 %v4815_v57, %v4973_v39 }
 0x368   : > { %v5056_v1 = vpop.permute.xlu0 %1523  ;;  %v1336_v30 = vmul.f32 %v4820_v20, %v4987_v43 }
 0x369   : > { %v3346_v55 = vpack.c.bf16 %v1698_v51, %v1697_v49  ;;  %v5058_v50 = vpop.permute.xlu1 %2199  ;;  %5566 = vst [vmem:[#allocation50_spill] sm:$0xff] %v5070_v18 }
 0x36b   : > { %3646 = vset.pattern.permute.xlu1 %v5552_v58  ;;  %3347 = vmatpush3.bf16.xpose.msra.mxu1 %v3346_v55 }
 0x36c   : > { %1533 = vperm.xlu1 %3646, %v4701_v44   ;;  %3348 = vmatprep.subr.bf16.mxu1 %v5559_v14 }
 0x36d   : > { %v5065_v52 = vpop.permute.xlu0 %1190 }
 0x36e   : > { %v1975_v40 = vpop.permute.xlu1 %1974 }
 0x36f   : > { %v2029_v60 = vmul.f32 %v4822_v23, %v1975_v40 }
 0x370   : > { %1548 = vperm.xlu1 %3646, %v4705_v45  }
 0x371   : > { %v5073_v29 = vadd.f32 %v2029_v60, %v4967_v26 }
 0x372   : > { %v5077_v4 = vpop.permute.xlu0 %1306 }
 0x373   : > { %5567 = vst [vmem:[#allocation51_spill] sm:$0xff] %v5073_v29  ;;  %v1519_v32 = vpop.permute.xlu1 %1518 }
 0x374   : > { %3651 = vset.pattern.permute.xlu1 %v5560_v38 }
 0x375   : > { %1195 = vperm.xlu1 %3651, %v4715_v46  }
 0x377   : > { %v5081_v63 = vpop.permute.xlu0 %1650 }
 0x378   : > { %v1639_v59 = vpop.permute.xlu1 %1638 }
 0x379   : > { %3652 = vset.pattern.permute.xlu1 %v5561_v34 }
 0x37a   : > { %1310 = vperm.xlu1 %3652, %v4715_v46  }
 0x37c   : > { %v5085_v54 = vpop.permute.xlu0 %1200 }
 0x37d   : > { %v5087_v26 = vpop.permute.xlu1 %2214 }
 0x37e   : > { %5568 = vst [vmem:[#allocation52_spill] sm:$0xff] %v5087_v26  ;;  %3654 = vset.pattern.permute.xlu1 %v5563_v2  ;;  %v1240_v26 = vadd.f32 %v1224_v22, %v4637_v5 }
 0x37f   : > { %1658 = vperm.xlu1 %3654, %v4715_v46  }
 0x380   : > { %v1352_v39 = vadd.f32 %v1336_v30, %v1240_v26  ;;  %v2031_v30 = vmul.f32 %v4822_v23, %v5015_v8 }
 0x381   : > { %v5091_v51 = vpop.permute.xlu0 %1314 }
 0x382   : > { %v1987_v49 = vpop.permute.xlu1 %1986 }
 0x383   : > { %3656 = vset.pattern.permute.xlu1 %v5552_v58  ;;  %v2032_v26 = vmul.f32 %v4822_v23, %v1987_v49 }
 0x384   : > { %1558 = vperm.xlu1 %3656, %v4721_v47  }
 0x386   : > { %v5095_v55 = vpop.permute.xlu0 %1662 }
 0x387   : > { %5569 = vst [vmem:[#allocation53_spill] sm:$0xff] %v5095_v55  ;;  %v1166_v42 = vpop.permute.xlu1 %1165  ;;  %v1572_v55 = vmul.f32 %v4834_v6, %v1519_v32 }
 0x388   : > { %3659 = vset.pattern.permute.xlu1 %v5563_v2  ;;  %v1223_v40 = vmul.f32 %v4815_v57, %v1166_v42 }
 0x389   : > { %1670 = vperm.xlu1 %3659, %v4721_v47  }
 0x38a   : > { %v1239_v29 = vadd.f32 %v1223_v40, %v4640_v7 }
 0x38b   : > { %v5104_v60 = vpop.permute.xlu0 %1543 }
 0x38c   : > { %5570 = vst [vmem:[#allocation54_spill] sm:$0xff] %v5104_v60  ;;  %v1287_v27 = vpop.permute.xlu1 %1286  ;;  %v1684_v60 = vmul.f32 %v4845_v12, %v1639_v59 }
 0x38d   : > { %v1335_v18 = vmul.f32 %v4820_v20, %v1287_v27  ;;  %3660 = vset.pattern.permute.xlu1 %v5560_v38  ;;  %v1683_v38 = vmul.f32 %v4845_v12, %v5009_v0  ;;  %v1920_v27 = vmul.f32 %v4818_v16, %v5004_v35 }
 0x38e   : > { %1205 = vperm.xlu1 %3660, %v4759_v48  }
 0x38f   : > { %v1351_v42 = vadd.f32 %v1335_v18, %v1239_v29  ;;  %v1588_v18 = vadd.f32 %v1572_v55, %v4637_v5  ;;  %v1936_v55 = vadd.f32 %v1920_v27, %v4637_v5 }
 0x390   : > { %v5112_v19 = vpop.permute.xlu0 %1210 }
 0x391   : > { %v3325_v43 = vpack.c.bf16 %v1352_v39, %v1351_v42  ;;  %v1514_v17 = vpop.permute.xlu1 %1513  ;;  %v5137_v39 = vadd.f32 %v2032_v26, %v1936_v55 }
 0x392   : > { %v1571_v22 = vmul.f32 %v4834_v6, %v1514_v17  ;;  %3661 = vset.pattern.permute.xlu1 %v5561_v34  ;;  %v1700_v17 = vadd.f32 %v1684_v60, %v1588_v18 }
 0x393   : > { %1318 = vperm.xlu1 %3661, %v4759_v48   ;;  %3326 = vmatpush3.bf16.xpose.msra.mxu0 %v3325_v43 }
 0x394   : > { %v1587_v29 = vadd.f32 %v1571_v22, %v4640_v7  ;;  %3327 = vmatprep.subr.bf16.mxu0 %v5559_v14 }
 0x395   : > { %v5125_v32 = vpop.permute.xlu0 %1322 }
 0x396   : > { %v1699_v59 = vadd.f32 %v1683_v38, %v1587_v29  ;;  %v1862_v34 = vpop.permute.xlu1 %1861  ;;  %v2265_v38 = vmul.f32 %v4800_v62, %v5058_v50 }
 0x397   : > { %v1919_v40 = vmul.f32 %v4818_v16, %v1862_v34  ;;  %3662 = vset.pattern.permute.xlu1 %v5552_v58 }
 0x398   : > { %v3349_v0 = vpack.c.bf16 %v1700_v17, %v1699_v59  ;;  %1553 = vperm.xlu1 %3662, %v4759_v48  }
 0x399   : > { %v1935_v35 = vadd.f32 %v1919_v40, %v4640_v7 }
 0x39a   : > { %3350 = vmatpush3.bf16.xpose.msra.mxu1 %v3349_v0  ;;  %v5135_v60 = vpop.permute.xlu0 %1881 }
 0x39b   : > { %v5139_v49 = vadd.f32 %v2031_v30, %v1935_v35  ;;  %v2210_v42 = vpop.permute.xlu1 %2209  ;;  %3351 = vmatprep.subr.bf16.mxu1 %v5559_v14 }
 0x39c   : > { %v2267_v58 = vmul.f32 %v4800_v62, %v2210_v42  ;;  %3663 = vset.pattern.permute.xlu1 %v5563_v2  ;;  %v2378_v2 = vmul.f32 %v4863_v31, %v5023_v36 }
 0x39d   : > { %v3373_v43 = vpack.c.bf16 %v5137_v39, %v5139_v49  ;;  %1666 = vperm.xlu1 %3663, %v4759_v48   ;;  %v5351_v49 = vld [vmem:[#allocation21 + $0x5] ss:$0 sm:$0xff] }
 0x39e   : > { %v2283_v8 = vadd.f32 %v2267_v58, %v4640_v7  ;;  %v5148_v22 = vpop.permute.xlu0 %1896  ;;  %v2281_v7 = vadd.f32 %v2265_v38, %v4634_v3  ;;  %v5162_v50 = vadd.f32 %v2378_v2, %v4947_v28  ;;  %v2034_v3 = vmul.f32 %v4822_v23, %v5047_v25 }
 0x39f   : > { %v1338_v2 = vmul.f32 %v4820_v20, %v5027_v61 }
 0x3a0   : > { %v2331_v18 = vpop.permute.xlu1 %2330 }
 0x3a1   : > { %v2379_v29 = vmul.f32 %v4863_v31, %v2331_v18  ;;  %3664 = vset.pattern.permute.xlu1 %v5555_v56  ;;  %v1226_v18 = vmul.f32 %v4815_v57, %v5021_v10  ;;  %v1573_v10 = vmul.f32 %v4834_v6, %v5056_v1 }
 0x3a2   : > { %1886 = vperm.xlu1 %3664, %v4695_v41  }
 0x3a3   : > { %v5157_v27 = vadd.f32 %v2379_v29, %v2283_v8  ;;  %v2323_v17 = vpop.permute.xlu0 %2322 }
 0x3a4   : > { %v2377_v59 = vmul.f32 %v4863_v31, %v2323_v17 }
 0x3a5   : > { %v1529_v34 = vpop.permute.xlu1 %1528 }
 0x3a6   : > { %v5164_v26 = vadd.f32 %v2377_v59, %v2281_v7  ;;  %3665 = vset.pattern.permute.xlu1 %v5558_v24  ;;  %v1574_v17 = vmul.f32 %v4834_v6, %v1529_v34  ;;  %v1242_v7 = vadd.f32 %v1226_v18, %v4643_v9 }
 0x3a7   : > { %2229 = vperm.xlu1 %3665, %v4701_v44   ;;  %v5187_v38 = vpop.permute.xlu0 %2334 }
 0x3a8   : > { %v3394_v36 = vpack.c.bf16 %v5162_v50, %v5164_v26  ;;  %v1590_v34 = vadd.f32 %v1574_v17, %v4643_v9 }
 0x3aa   : > { %v1877_v40 = vpop.permute.xlu1 %1876 }
 0x3ab   : > { %v1922_v0 = vmul.f32 %v4818_v16, %v1877_v40  ;;  %3666 = vset.pattern.permute.xlu1 %v5550_v53 }
 0x3ac   : > { %1998 = vperm.xlu1 %3666, %v4701_v44  }
 0x3ad   : > { %v1938_v28 = vadd.f32 %v1922_v0, %v4643_v9  ;;  %v5203_v0 = vpop.permute.xlu0 %2346 }
 0x3af   : > { %v5176_v55 = vadd.f32 %v2034_v3, %v1938_v28  ;;  %v2225_v30 = vpop.permute.xlu1 %2224  ;;  %v1354_v3 = vadd.f32 %v1338_v2, %v1242_v7 }
 0x3b0   : > { %2002 = vperm.xlu1 %3666, %v4695_v41   ;;  %v2270_v35 = vmul.f32 %v4800_v62, %v2225_v30 }
 0x3b1   : > { %v5211_v1 = vpop.permute.xlu0 %2358 }
 0x3b2   : > { %v2286_v58 = vadd.f32 %v2270_v35, %v4643_v9  ;;  %v1686_v35 = vmul.f32 %v4845_v12, %v5036_v37 }
 0x3b4   : > { %3667 = vset.pattern.permute.xlu1 %v5557_v33  ;;  %v2343_v42 = vpop.permute.xlu1 %2342 }
 0x3b5   : > { %v2382_v8 = vmul.f32 %v4863_v31, %v2343_v42  ;;  %2350 = vperm.xlu1 %3667, %v4695_v41   ;;  %v1589_v42 = vadd.f32 %v1573_v10, %v4646_v11  ;;  %v2220_v37 = vpop.permute.xlu0 %2219 }
 0x3b6   : > { %v2269_v7 = vmul.f32 %v4800_v62, %v2220_v37 }
 0x3b7   : > { %v5184_v44 = vadd.f32 %v2382_v8, %v2286_v58  ;;  %v1702_v8 = vadd.f32 %v1686_v35, %v1590_v34  ;;  %v1340_v34 = vmul.f32 %v4820_v20, %v5077_v4 }
 0x3b9   : > { %3668 = vset.pattern.permute.xlu1 %v5555_v56  ;;  %v1176_v25 = vpop.permute.xlu1 %1175 }
 0x3ba   : > { %1891 = vperm.xlu1 %3668, %v4715_v46   ;;  %v1225_v29 = vmul.f32 %v4815_v57, %v1176_v25 }
 0x3bc   : > { %v1241_v59 = vadd.f32 %v1225_v29, %v4646_v11 }
 0x3be   : > { %3670 = vset.pattern.permute.xlu1 %v5558_v24  ;;  %v1295_v41 = vpop.permute.xlu1 %1294 }
 0x3bf   : > { %v1337_v40 = vmul.f32 %v4820_v20, %v1295_v41  ;;  %2239 = vperm.xlu1 %3670, %v4715_v46  }
 0x3c1   : > { %v1353_v61 = vadd.f32 %v1337_v40, %v1241_v59  ;;  %v2285_v40 = vadd.f32 %v2269_v7, %v4646_v11  ;;  %v1342_v7 = vmul.f32 %v4820_v20, %v5091_v51 }
 0x3c3   : > { %v3328_v28 = vpack.c.bf16 %v1354_v3, %v1353_v61  ;;  %2244 = vperm.xlu1 %3670, %v4705_v45   ;;  %v1643_v30 = vpop.permute.xlu1 %1642  ;;  %v1228_v3 = vmul.f32 %v4815_v57, %v5065_v52 }
 0x3c4   : > { %v1685_v58 = vmul.f32 %v4845_v12, %v1643_v30 }
 0x3c5   : > { %3329 = vmatpush3.bf16.xpose.msra.mxu0 %v3328_v28  ;;  %v1244_v30 = vadd.f32 %v1228_v3, %v4649_v13 }
 0x3c6   : > { %v1701_v25 = vadd.f32 %v1685_v58, %v1589_v42  ;;  %3330 = vmatprep.subr.bf16.mxu0 %v5559_v14 }
 0x3c7   : > { %3671 = vset.pattern.permute.xlu1 %v5550_v53  ;;  %v1356_v58 = vadd.f32 %v1340_v34, %v1244_v30 }
 0x3c8   : > { %v3352_v9 = vpack.c.bf16 %v1702_v8, %v1701_v25  ;;  %2010 = vperm.xlu1 %3671, %v4705_v45   ;;  %v1872_v18 = vpop.permute.xlu1 %1871 }
 0x3c9   : > { %v1921_v29 = vmul.f32 %v4818_v16, %v1872_v18 }
 0x3ca   : > { %3353 = vmatpush3.bf16.xpose.msra.mxu1 %v3352_v9 }
 0x3cb   : > { %3354 = vmatprep.subr.bf16.mxu1 %v5559_v14  ;;  %v1937_v17 = vadd.f32 %v1921_v29, %v4646_v11 }
 0x3cc   : > { %3672 = vset.pattern.permute.xlu1 %v5557_v33 }
 0x3cd   : > { %2354 = vperm.xlu1 %3672, %v4715_v46   ;;  %v1991_v2 = vpop.permute.xlu1 %1990 }
 0x3ce   : > { %v2033_v41 = vmul.f32 %v4822_v23, %v1991_v2 }
 0x3d0   : > { %v5223_v59 = vadd.f32 %v2033_v41, %v1937_v17 }
 0x3d1   : > { %3674 = vset.pattern.permute.xlu1 %v5555_v56 }
 0x3d2   : > { %v3376_v45 = vpack.c.bf16 %v5176_v55, %v5223_v59  ;;  %1906 = vperm.xlu1 %3674, %v4721_v47   ;;  %v2339_v16 = vpop.permute.xlu1 %2338 }
 0x3d3   : > { %v2381_v46 = vmul.f32 %v4863_v31, %v2339_v16 }
 0x3d5   : > { %v5231_v10 = vadd.f32 %v2381_v46, %v2285_v40  ;;  %v5571_v46 = vld [vmem:[#allocation34_spill] sm:$0xff] }
 0x3d6   : > { %1901 = vperm.xlu1 %3674, %v4759_v48  }
 0x3d7   : > { %v3400_v62 = vpack.c.bf16 %v5184_v44, %v5231_v10  ;;  %v1539_v23 = vpop.permute.xlu1 %1538 }
 0x3d8   : > { %v1576_v52 = vmul.f32 %v4834_v6, %v1539_v23 }
 0x3da   : > { %3676 = vset.pattern.permute.xlu1 %v5558_v24  ;;  %v1592_v18 = vadd.f32 %v1576_v52, %v4649_v13 }
 0x3db   : > { %2254 = vperm.xlu1 %3676, %v4721_v47  }
 0x3dc   : > { %v1655_v56 = vpop.permute.xlu1 %1654 }
 0x3dd   : > { %v1688_v9 = vmul.f32 %v4845_v12, %v1655_v56 }
 0x3df   : > { %3677 = vset.pattern.permute.xlu1 %v5550_v53  ;;  %v1704_v37 = vadd.f32 %v1688_v9, %v1592_v18 }
 0x3e0   : > { %2014 = vperm.xlu1 %3677, %v4759_v48  }
 0x3e1   : > { %v1186_v11 = vpop.permute.xlu1 %1185 }
 0x3e2   : > { %v1227_v61 = vmul.f32 %v4815_v57, %v1186_v11  ;;  %v5573_v11 = vld [vmem:[#allocation54_spill] sm:$0xff] }
 0x3e3   : > { %v1577_v3 = vmul.f32 %v4834_v6, %v5573_v11  ;;  %v5578_v11 = vld [vmem:[#allocation33_spill] sm:$0xff] }
 0x3e4   : > { %3678 = vset.pattern.permute.xlu1 %v5557_v33  ;;  %v1243_v35 = vadd.f32 %v1227_v61, %v4652_v15 }
 0x3e5   : > { %2362 = vperm.xlu1 %3678, %v4759_v48   ;;  %v1687_v48 = vmul.f32 %v4845_v12, %v5081_v63  ;;  %v1230_v63 = vmul.f32 %v4815_v57, %v5085_v54 }
 0x3e6   : > { %v1303_v28 = vpop.permute.xlu1 %1302 }
 0x3e7   : > { %v1339_v42 = vmul.f32 %v4820_v20, %v1303_v28  ;;  %v1246_v23 = vadd.f32 %v1230_v63, %v5571_v46 }
 0x3e9   : > { %v1355_v8 = vadd.f32 %v1339_v42, %v1243_v35  ;;  %2366 = vperm.xlu1 %3678, %v4721_v47   ;;  %v1358_v61 = vadd.f32 %v1342_v7, %v1246_v23  ;;  %v5574_v35 = vld [vmem:[#allocation53_spill] sm:$0xff]  ;;  %v2690_v7 = vld [vmem:[#allocation12] ss:$0 sm:$0xff]  ;;  %v5577_v23 = vld [vmem:[#allocation39_spill] sm:$0xff] }
 0x3ea   : > { %v1690_v51 = vmul.f32 %v4845_v12, %v5574_v35  ;;  %v2696_v35 = vld [vmem:[#allocation20 + $0x2] ss:$0 sm:$0xff] }
 0x3eb   : > { %v3331_v25 = vpack.c.bf16 %v1356_v58, %v1355_v8  ;;  %v1534_v33 = vpop.permute.xlu1 %1533 }
 0x3ec   : > { %v1575_v4 = vmul.f32 %v4834_v6, %v1534_v33 }
 0x3ed   : > { %3680 = vset.pattern.permute.xlu1 %v5558_v24  ;;  %3332 = vmatpush3.bf16.xpose.msra.mxu0 %v3331_v25 }
 0x3ee   : > { %v1591_v29 = vadd.f32 %v1575_v4, %v4652_v15  ;;  %2150 = vperm.xlu1 %3680, %v4660_v21   ;;  %3333 = vmatprep.subr.bf16.mxu0 %v5559_v14 }
 0x3ef   : > { %v1549_v47 = vpop.permute.xlu1 %1548 }
 0x3f0   : > { %v1703_v2 = vadd.f32 %v1687_v48, %v1591_v29  ;;  %v1578_v16 = vmul.f32 %v4834_v6, %v1549_v47  ;;  %v1232_v48 = vmul.f32 %v4815_v57, %v5112_v19  ;;  %v1344_v29 = vmul.f32 %v4820_v20, %v5125_v32 }
 0x3f2   : > { %v3355_v17 = vpack.c.bf16 %v1704_v37, %v1703_v2  ;;  %3681 = vset.pattern.permute.xlu1 %v5550_v53  ;;  %v5572_v53 = vld [vmem:[#allocation35_spill] sm:$0xff]  ;;  %v1594_v54 = vadd.f32 %v1578_v16, %v5571_v46  ;;  %v5575_v2 = vld [vmem:[#allocation36_spill] sm:$0xff] }
 0x3f3   : > { %1947 = vperm.xlu1 %3681, %v4660_v21   ;;  %v1593_v42 = vadd.f32 %v1577_v3, %v5572_v53  ;;  %v2692_v37 = vld [vmem:[#allocation20] ss:$0 sm:$0xff]  ;;  %v2694_v3 = vld [vmem:[#allocation20 + $0x1] ss:$0 sm:$0xff] }
 0x3f4   : > { %v1196_v24 = vpop.permute.xlu1 %1195  ;;  %3356 = vmatpush3.bf16.xpose.msra.mxu1 %v3355_v17  ;;  %v1706_v8 = vadd.f32 %v1690_v51, %v1594_v54  ;;  %v1248_v17 = vadd.f32 %v1232_v48, %v5575_v2  ;;  %v5579_v54 = vld [vmem:[#allocation38_spill] sm:$0xff] }
 0x3f5   : > { %3357 = vmatprep.subr.bf16.mxu1 %v5559_v14  ;;  %v1229_v41 = vmul.f32 %v4815_v57, %v1196_v24  ;;  %v5576_v24 = vld [vmem:[#allocation37_spill] sm:$0xff] }
 0x3f6   : > { %v1360_v16 = vadd.f32 %v1344_v29, %v1248_v17  ;;  %v5585_v17 = vld [vmem:[#allocation41_spill] sm:$0xff] }
 0x3f7   : > { %v1245_v56 = vadd.f32 %v1229_v41, %v5572_v53 }
 0x3f9   : > { %v1311_v40 = vpop.permute.xlu1 %1310 }
 0x3fa   : > { %v1341_v21 = vmul.f32 %v4820_v20, %v1311_v40 }
 0x3fc   : > { %v1357_v34 = vadd.f32 %v1341_v21, %v1245_v56  ;;  %v1114_v56 = vmul.f32 %v2692_v37, %v5577_v23  ;;  %v2698_v37 = vld [vmem:[#allocation20 + $0x3] ss:$0 sm:$0xff] }
 0x3fe   : > { %v3334_v28 = vpack.c.bf16 %v1358_v61, %v1357_v34  ;;  %v1659_v30 = vpop.permute.xlu1 %1658 }
 0x3ff   : > { %v1689_v58 = vmul.f32 %v4845_v12, %v1659_v30 }
 0x400   : > { %3335 = vmatpush3.bf16.xpose.msra.mxu0 %v3334_v28  ;;  %v1258_v28 = vmul.f32 %v2694_v3, %v5579_v54  ;;  %v5596_v54 = vld [vmem:[#allocation49_spill] sm:$0xff] }
 0x401   : > { %v1705_v52 = vadd.f32 %v1689_v58, %v1593_v42  ;;  %3336 = vmatprep.subr.bf16.mxu0 %v5559_v14 }
 0x403   : > { %v3358_v25 = vpack.c.bf16 %v1706_v8, %v1705_v52  ;;  %v1559_v33 = vpop.permute.xlu1 %1558 }
 0x404   : > { %v1580_v32 = vmul.f32 %v4834_v6, %v1559_v33 }
 0x405   : > { %3359 = vmatpush3.bf16.xpose.msra.mxu1 %v3358_v25  ;;  %v5580_v25 = vld [vmem:[#allocation40_spill] sm:$0xff] }
 0x406   : > { %3360 = vmatprep.subr.bf16.mxu1 %v5559_v14  ;;  %v1596_v51 = vadd.f32 %v1580_v32, %v5575_v2  ;;  %v1461_v33 = vmul.f32 %v2696_v35, %v5580_v25  ;;  %v5592_v32 = vld [vmem:[#allocation50_spill] sm:$0xff]  ;;  %v5331_v35 = vld [vmem:[#allocation21 + $0x6] ss:$0 sm:$0xff]  ;;  %v5346_v25 = vld [vmem:[#allocation21 + $0x4] ss:$0 sm:$0xff] }
 0x407   : > { %v1923_v39 = vmul.f32 %v5346_v25, %v5135_v60 }
 0x408   : > { %v1671_v9 = vpop.permute.xlu1 %1670 }
 0x409   : > { %v1939_v60 = vadd.f32 %v1923_v39, %v4652_v15 }
 0x40d   : > { %v1206_v4 = vpop.permute.xlu1 %1205 }
 0x40e   : > { %v1231_v18 = vmul.f32 %v4815_v57, %v1206_v4  ;;  %v5292_v57 = vadd.f32 %v2690_v7, %v5578_v11 }
 0x410   : > { %v1247_v63 = vadd.f32 %v1231_v18, %v5576_v24  ;;  %v1115_v34 = vadd.f32 %v1114_v56, %v5292_v57  ;;  %v5581_v18 = vld [vmem:[#allocation42_spill] sm:$0xff] }
 0x412   : > { %v1319_v47 = vpop.permute.xlu1 %1318  ;;  %v1259_v8 = vadd.f32 %v1258_v28, %v1115_v34 }
 0x413   : > { %v1343_v41 = vmul.f32 %v4820_v20, %v1319_v47  ;;  %v1692_v20 = vmul.f32 %v4845_v12, %v1671_v9  ;;  %v5582_v9 = vld [vmem:[#allocation43_spill] sm:$0xff]  ;;  %v5584_v47 = vmov 0.0  }
 0x414   : > { %v5583_v29 = vpack.c.bf16 %v5581_v18, %v5582_v9 }
 0x415   : > { %v1359_v40 = vadd.f32 %v1343_v41, %v1247_v63  ;;  %v1708_v52 = vadd.f32 %v1692_v20, %v1596_v51  ;;  %v1606_v63 = vmul.f32 %v2698_v37, %v5585_v17  ;;  %v5595_v20 = vld [vmem:[#allocation48_spill] sm:$0xff] }
 0x416   : > { %v5597_v28 = vpack.c.bf16 %v5595_v20, %v5596_v54  ;;  %v5598_v51 = vld [vmem:[#allocation52_spill] sm:$0xff] }
 0x417   : > { %v3337_v21 = vpack.c.bf16 %v1360_v16, %v1359_v40  ;;  %v1554_v19 = vpop.permute.xlu1 %1553  ;;  %v5586_v16 = vld [vmem:[#allocation46_spill] sm:$0xff]  ;;  %v5587_v40 = vld [vmem:[#allocation47_spill] sm:$0xff] }
 0x418   : > { %v1579_v61 = vmul.f32 %v4834_v6, %v1554_v19  ;;  %v5588_v23 = vpack.c.bf16 %v5586_v16, %v5587_v40  ;;  %v5590_v19 = vld [vmem:[#allocation45_spill] sm:$0xff] }
 0x419   : > { %3338 = vmatpush3.bf16.xpose.msra.mxu0 %v3337_v21  ;;  %v5589_v21 = vld [vmem:[#allocation44_spill] sm:$0xff] }
 0x41a   : > { %3363 = vmatprep.subr.bf16.mxu0 %v5559_v14  ;;  %v1595_v42 = vadd.f32 %v1579_v61, %v5576_v24  ;;  %v5591_v11 = vpack.c.bf16 %v5589_v21, %v5590_v19  ;;  %v5593_v61 = vld [vmem:[#allocation51_spill] sm:$0xff] }
 0x41b   : > { %v5594_v34 = vpack.c.bf16 %v5592_v32, %v5593_v61 }
 0x41c   : > { %v1667_v30 = vpop.permute.xlu1 %1666 }
 0x41d   : > { %v1691_v58 = vmul.f32 %v4845_v12, %v1667_v30  ;;  %v1462_v12 = vadd.f32 %v1461_v33, %v5292_v57 }
 0x41f   : > { %v1707_v6 = vadd.f32 %v1691_v58, %v1595_v42  ;;  %v1607_v7 = vadd.f32 %v1606_v63, %v1462_v12  ;;  %v2268_v42 = vmul.f32 %v5331_v35, %v5598_v51  ;;  %v2380_v58 = vmul.f32 %v4863_v31, %v5187_v38  ;;  %v3686_v12 = vld [vmem:[#allocation21 + $0x7] ss:$0 sm:$0xff] }
 0x420   : > { %3096 = vmatmul.mubr.f32.vlgmr.msra.gmra.mrb[4].mxu0 %v1259_v8 }
 0x421   : > { %v3361_v4 = vpack.c.bf16 %v1708_v52, %v1707_v6  ;;  %v1887_v48 = vpop.permute.xlu1 %1886  ;;  %3365 = vmatpush3.bf16.xpose.msra.mxu0 %v5583_v29  ;;  %3165 = vmatprep.mubr.msk.f32.mxu0 %vm4078_vm0, %v5584_v47  ;;  %v2284_v52 = vadd.f32 %v2268_v42, %v4637_v5  ;;  %v2235_v5 = vpop.permute.xlu0 %2234 }
 0x422   : > { %3366 = vmatprep.subr.bf16.mxu0 %v5559_v14  ;;  %v1924_v31 = vmul.f32 %v5346_v25, %v1887_v48  ;;  %v2272_v29 = vmul.f32 %v5331_v35, %v2235_v5 }
 0x423   : > { %3362 = vmatpush3.bf16.xpose.msra.mxu1 %v3361_v4  ;;  %v2396_v6 = vadd.f32 %v2380_v58, %v2284_v52 }
 0x424   : > { %3387 = vmatprep.subr.bf16.mxu1 %v5559_v14  ;;  %v1940_v50 = vadd.f32 %v1924_v31, %v4649_v13 }
 0x425   : > { %v3397_v33 = vpack.c.bf16 %v2396_v6, %v5157_v27  ;;  %v1926_v27 = vmul.f32 %v5346_v25, %v5148_v22  ;;  %v2250_v9 = vpop.permute.xlu0 %2249 }
 0x426   : > { %v2230_v41 = vpop.permute.xlu1 %2229 }
 0x427   : > { %v2271_v55 = vmul.f32 %v5331_v35, %v2230_v41  ;;  %v1942_v37 = vadd.f32 %v1926_v27, %v5571_v46  ;;  %v2700_v27 = vld [vmem:[#allocation20 + $0x4] ss:$0 sm:$0xff] }
 0x429   : > { %3368 = vmatpush3.bf16.xpose.msra.mxu0 %v5588_v23  ;;  %v2007_v22 = vpop.permute.xlu0 %2006  ;;  %v2287_v41 = vadd.f32 %v2271_v55, %v4652_v15  ;;  %v2706_v55 = vld [vmem:[#allocation20 + $0x7] ss:$0 sm:$0xff] }
 0x42a   : > { %3131 = vmatmul.mubr.f32.vlgmr.msra.gmra.mrb[32].mxu1 %v1607_v7  ;;  %3369 = vmatprep.subr.bf16.mxu0 %v5559_v14  ;;  %v2288_v7 = vadd.f32 %v2272_v29, %v4649_v13  ;;  %v2037_v16 = vmul.f32 %v5351_v49, %v2007_v22 }
 0x42b   : > { %v1999_v56 = vpop.permute.xlu1 %1998  ;;  %3389 = vmatpush3.bf16.xpose.msra.mxu1 %v5591_v11  ;;  %3200 = vmatprep.mubr.msk.f32.mxu1 %vm4078_vm0, %v5584_v47 }
 0x42c   : > { %3390 = vmatprep.subr.bf16.mxu1 %v5559_v14  ;;  %v2035_v26 = vmul.f32 %v5351_v49, %v1999_v56  ;;  %v2383_v56 = vmul.f32 %v3686_v12, %v5203_v0  ;;  %v2386_v0 = vmul.f32 %v3686_v12, %v5211_v1 }
 0x42e   : > { %v2051_v48 = vadd.f32 %v2035_v26, %v1939_v60  ;;  %v2399_v11 = vadd.f32 %v2383_v56, %v2287_v41 }
 0x42f   : > { %v2003_v3 = vpop.permute.xlu1 %2002 }
 0x431   : > { %3371 = vmatpush3.bf16.xpose.msra.mxu0 %v5594_v34 }
 0x432   : > { %3372 = vmatprep.subr.bf16.mxu0 %v5559_v14 }
 0x433   : > { %3392 = vmatpush3.bf16.xpose.msra.mxu1 %v5597_v28 }
 0x434   : > { %v2351_v30 = vpop.permute.xlu1 %2350  ;;  %3393 = vmatprep.subr.bf16.mxu1 %v5559_v14 }
 0x435   : > { %v2384_v17 = vmul.f32 %v3686_v12, %v2351_v30 }
 0x437   : > { %v2400_v21 = vadd.f32 %v2384_v17, %v2288_v7 }
 0x439   : > { %v1892_v8 = vpop.permute.xlu1 %1891  ;;  %3374 = vmatpush3.bf16.xpose.msra.mxu0 %v3373_v43  ;;  %v2036_v43 = vmul.f32 %v5351_v49, %v2003_v3  ;;  %v3403_v61 = vpack.c.bf16 %v2400_v21, %v2399_v11 }
 0x43a   : > { %3375 = vmatprep.subr.bf16.mxu0 %v5559_v14  ;;  %v1925_v18 = vmul.f32 %v5346_v25, %v1892_v8 }
 0x43b   : > { %3395 = vmatpush3.bf16.xpose.msra.mxu1 %v3394_v36  ;;  %v2052_v4 = vadd.f32 %v2036_v43, %v1940_v50  ;;  %v2275_v43 = vmul.f32 %v5331_v35, %v2250_v9 }
 0x43c   : > { %3396 = vmatprep.subr.bf16.mxu1 %v5559_v14  ;;  %v1941_v63 = vadd.f32 %v1925_v18, %v5572_v53 }
 0x43d   : > { %v3379_v59 = vpack.c.bf16 %v2052_v4, %v2051_v48 }
 0x43e   : > { %v2240_v38 = vpop.permute.xlu1 %2239  ;;  %v2053_v19 = vadd.f32 %v2037_v16, %v1941_v63 }
 0x43f   : > { %v2273_v3 = vmul.f32 %v5331_v35, %v2240_v38 }
 0x441   : > { %3377 = vmatpush3.bf16.xpose.msra.mxu0 %v3376_v45  ;;  %v2289_v44 = vadd.f32 %v2273_v3, %v5572_v53 }
 0x442   : > { %v2245_v36 = vpop.permute.xlu1 %2244  ;;  %3378 = vmatprep.subr.bf16.mxu0 %v5559_v14 }
 0x443   : > { %3398 = vmatpush3.bf16.xpose.msra.mxu1 %v3397_v33  ;;  %v2274_v13 = vmul.f32 %v5331_v35, %v2245_v36  ;;  %v2291_v33 = vadd.f32 %v2275_v43, %v5576_v24 }
 0x444   : > { %3399 = vmatprep.subr.bf16.mxu1 %v5559_v14 }
 0x445   : > { %v2290_v10 = vadd.f32 %v2274_v13, %v5571_v46  ;;  %v2019_v46 = vpop.permute.xlu0 %2018 }
 0x446   : > { %v2040_v8 = vmul.f32 %v5351_v49, %v2019_v46 }
 0x447   : > { %v2011_v45 = vpop.permute.xlu1 %2010  ;;  %v2402_v54 = vadd.f32 %v2386_v0, %v2290_v10 }
 0x448   : > { %v2038_v47 = vmul.f32 %v5351_v49, %v2011_v45  ;;  %v2702_v45 = vld [vmem:[#allocation20 + $0x5] ss:$0 sm:$0xff] }
 0x449   : > { %3380 = vmatpush3.bf16.xpose.msra.mxu0 %v3379_v59  ;;  %v1803_v50 = vpop.permute.xlu0 %1802 }
 0x44a   : > { %3381 = vmatprep.subr.bf16.mxu0 %v5559_v14  ;;  %v2054_v40 = vadd.f32 %v2038_v47, %v1942_v37  ;;  %v1809_v9 = vmul.f32 %v2700_v27, %v1803_v50 }
 0x44b   : > { %3401 = vmatpush3.bf16.xpose.msra.mxu1 %v3400_v62 }
 0x44c   : > { %v2355_v23 = vpop.permute.xlu1 %2354  ;;  %3402 = vmatprep.subr.bf16.mxu1 %v5559_v14  ;;  %v3382_v32 = vpack.c.bf16 %v2054_v40, %v2053_v19 }
 0x44d   : > { %v2385_v15 = vmul.f32 %v3686_v12, %v2355_v23 }
 0x44f   : > { %v2401_v62 = vadd.f32 %v2385_v15, %v2289_v44 }
 0x451   : > { %v1907_v34 = vpop.permute.xlu1 %1906  ;;  %3383 = vmatpush3.bf16.xpose.msra.mxu0 %v3382_v32  ;;  %v3406_v28 = vpack.c.bf16 %v2402_v54, %v2401_v62 }
 0x452   : > { %3384 = vmatprep.subr.bf16.mxu0 %v5559_v14  ;;  %v1928_v30 = vmul.f32 %v5346_v25, %v1907_v34 }
 0x453   : > { %3404 = vmatpush3.bf16.xpose.msra.mxu1 %v3403_v61 }
 0x454   : > { %3405 = vmatprep.subr.bf16.mxu1 %v5559_v14  ;;  %v1944_v53 = vadd.f32 %v1928_v30, %v5575_v2 }
 0x455   : > { %v1902_v20 = vpop.permute.xlu1 %1901 }
 0x456   : > { %v1927_v42 = vmul.f32 %v5346_v25, %v1902_v20  ;;  %v2056_v6 = vadd.f32 %v2040_v8, %v1944_v53 }
 0x458   : > { %v1943_v1 = vadd.f32 %v1927_v42, %v5576_v24 }
 0x45a   : > { %v2255_v51 = vpop.permute.xlu1 %2254 }
 0x45b   : > { %3407 = vmatpush3.bf16.xpose.msra.mxu1 %v3406_v28  ;;  %v2276_v25 = vmul.f32 %v5331_v35, %v2255_v51  ;;  %v2296_v35 = vpop.permute.xlu0 %2295 }
 0x45c   : > { %3408 = vmatprep.subr.bf16.mxu1 %v5559_v14  ;;  %v2302_v24 = vmul.f32 %v2706_v55, %v2296_v35 }
 0x45d   : > { %v2292_v26 = vadd.f32 %v2276_v25, %v5575_v2  ;;  %v1810_v2 = vadd.f32 %v1809_v9, %v5292_v57 }
 0x45f   : > { %v2015_v58 = vpop.permute.xlu1 %2014 }
 0x460   : > { %v2039_v52 = vmul.f32 %v5351_v49, %v2015_v58  ;;  %v2704_v49 = vld [vmem:[#allocation20 + $0x6] ss:$0 sm:$0xff] }
 0x462   : > { %v2055_v31 = vadd.f32 %v2039_v52, %v1943_v1 }
 0x464   : > { %v3385_v38 = vpack.c.bf16 %v2056_v6, %v2055_v31  ;;  %v2363_v39 = vpop.permute.xlu1 %2362 }
 0x465   : > { %v2387_v14 = vmul.f32 %v3686_v12, %v2363_v39 }
 0x466   : > { %3386 = vmatpush3.bf16.xpose.msra.mxu0 %v3385_v38 }
 0x467   : > { %v2403_v60 = vadd.f32 %v2387_v14, %v2291_v33 }
 0x468   : > { %v2367_v5 = vpop.permute.xlu1 %2366 }
 0x469   : > { %v2388_v36 = vmul.f32 %v3686_v12, %v2367_v5 }
 0x46b   : > { %v2404_v4 = vadd.f32 %v2388_v36, %v2292_v26 }
 0x46d   : > { %v3409_v48 = vpack.c.bf16 %v2404_v4, %v2403_v60  ;;  %v2151_v18 = vpop.permute.xlu1 %2150 }
 0x46e   : > { %v2157_v29 = vmul.f32 %v2704_v49, %v2151_v18 }
 0x46f   : > { %3410 = vmatpush3.bf16.xpose.msra.mxu1 %v3409_v48 }
 0x470   : > { %v2158_v59 = vadd.f32 %v2157_v29, %v5292_v57 }
 0x472   : > { %v1948_v47 = vpop.permute.xlu1 %1947  ;;  %v2303_v12 = vadd.f32 %v2302_v24, %v2158_v59 }
 0x473   : > { %v1954_v37 = vmul.f32 %v2702_v45, %v1948_v47 }
 0x475   : > { %v1955_v17 = vadd.f32 %v1954_v37, %v1810_v2 }
 0x476   : > { %3201 = vmatmul.mubr.f32.vlgmr.msra.gmra.mrb[34].mxu1 %v2303_v12 }
 0x477   : > { %3166 = vmatmul.mubr.f32.vlgmr.msra.gmra.mrb[6].mxu0 %v1955_v17 }
 0x4f3   : > { %v1427_v63 = vpop.f32.mrb[4].mxu0 }
 0x4f4   : > { %1431 = vst [vmem:[%s526_s21] sm:$0xff] %v1427_v63  ;;  %v3097_v22 = vpop.f32.mrb[5].mxu0 }
 0x4fd   : > { %v1775_v7 = vpop.f32.mrb[32].mxu1 }
 0x4fe   : > { %1779 = vst [vmem:[%s526_s21 + $0x8] sm:$0xff] %v1775_v7  ;;  %v3132_v16 = vpop.f32.mrb[33].mxu1 }
 0x549   : > { %v2471_v57 = vpop.f32.mrb[34].mxu1 }
 0x54a   : > { %2475 = vst [vmem:[%s526_s21 + $0x18] sm:$0xff] %v2471_v57  ;;  %v2123_v41 = vpop.f32.mrb[6].mxu0  ;;  %v3202_v40 = vpop.f32.mrb[35].mxu1 }
 0x54b   : > { %2127 = vst [vmem:[%s526_s21 + $0x10] sm:$0xff] %v2123_v41  ;;  %v3167_v23 = vpop.f32.mrb[7].mxu0 }
 0x54c   : > { %3984 = shalt.err (!%p3981_p1)
}
 0x54d   : > { %s3985_s0 = scalar_lea.hbm %s5407_s5, 512  ;;  %s3989_s22 = scalar_lea.hbm %s5599_s3, 1024 }
 0x54e   : > { %p3986_p13 = scmp.ne.s32.totalorder %s5407_s5, %s3985_s0  ;;  %p3990_p2 = scmp.lt.u32.totalorder %s5407_s5, %s5599_s3 }
 0x54f   : > { %p3991_p4 = scmp.lt.u32.totalorder %s3989_s22, %s3985_s0  ;;  %p3993_p5 = scmp.lt.u32.totalorder %s3985_s0, %s5407_s5 }
 0x550   : > { %p3987_p0 = pnand %p3986_p13, %p5600_p7 }
 0x551   : > { %p3992_p10 = por %p3991_p4, %p3990_p2 }
 0x552   : > { %p3988_p6 = pneg %p3987_p0 }
 0x553   : > { %p3994_p9 = por %p3993_p5, %p3992_p10 }
 0x555   : > { %p3995_p8 = pnand %p3994_p9, %p3988_p6 }
 0x557   : > { %3998 = shalt.err (!%p3995_p8)
}
 0x558   : > { %s4089_s25 = smov 128   ;;  %s4090_s24 = smov 8  }
 0x559   : > { %3447 = dma.vmem_to_hbm [thread:$0]  (%p5600_p7), %s5402_s29, 512, %s5407_s5, %s2477_s4, %s4089_s25, %s4089_s25, %s4090_s24  }
 0x55a PF: > { %s2505_s10 = sand.u32 1, %s4049_s13   ;;  %p5601_p11 = scmp.ne.s32.totalorder %s5523_s27, 0 }
 0x55b   : > { %p5602_p3 = scmp.ge.s32.totalorder %s4061_s16, 2  ;;  %s2506_s2 = scalar_lea.sflag [#allocation8], %s2505_s10 }
 0x55d   : > { %p3482_p12 = pnand %p5602_p3, %p5601_p11 }
 0x55f   : > { %4044 = dma.done.wait (!%p3482_p12), %s2506_s2, 512  }
 0x560   : > { %4046 = vsyncadd (!%p3482_p12), %s2506_s2, 4294966784  ;;  %p30_p1 = scmp.ge.s32.totalorder %s4372_s23, 4   ;;  %s5603_s13 = smov %s4053_s14 }
 0x561   : > { %s5604_s14 = smov %s4057_s15  ;;  %s5605_s15 = smov %s4383_s18 }
 0x562   : > { %s5606_s16 = smov %s4372_s23  ;;  %32 = sbr.rel (!%p30_p1) target bundleno = 18 (0x12), region = 156 }
 0x569   :  { %2511 = vsyncpa [#allocation7], 1 }
 0x56a   :  { %2513 = vsyncpa [#allocation7 + $0x1], 1 }
 0x56b   :  { %2514 = vsyncpa [#allocation10], 1 }
 0x56c   :  { %2516 = vsyncpa [#allocation10 + $0x1], 1 }
 0x56d   :  { %2517 = vsyncpa [#allocation13], 1 }
 0x56e   :  { %2518 = vsyncpa [#allocation16], 1 }
 0x56f   :  { %2519 = vsyncpa [#allocation19], 1 }
 0x570   :  { %2520 = vsyncpa [#allocation22], 1 }
 0x571   :  { %2521 = vsyncpa [#allocation8], 1 }
 0x572   :  { %2523 = vsyncpa [#allocation8 + $0x1], 1 }

</bundles_post_ra>
